<compile_context>
chip_gen: v7x
topology: tpu7x:2x2x1
jax: 0.10.0
libtpu: 0.0.40
codegen_flags: <defaults>
</compile_context>

<pallas_src>
import functools

import jax
import jax.numpy as jnp
from jax import lax
from jax.experimental import pallas as pl
from jax.experimental.pallas import tpu as pltpu

LN_EPS = 1e-5
NEG_BIAS = -1e30   # additive causal-mask bias; exp() underflows to exactly 0 in fp32


def _layernorm(v, w, b):
    mu = jnp.mean(v, axis=-1, keepdims=True)
    var = jnp.mean(jnp.square(v - mu), axis=-1, keepdims=True)
    return (v - mu) * lax.rsqrt(var + LN_EPS) * w + b


def clip_layer_kernel(x_ref, mask_ref, ln1w, ln1b, wqkv, bqkv, wo, bo,
                      ln2w, ln2b, fc1w, fc1b, fc2w, fc2b, flnw, flnb,
                      o_ref, *, H, do_final_ln):
    """One CLIP text-encoder layer for a single batch element ([1, S, D] block).

    Weights are bf16 (MXU-friendly); accumulation, layernorm and softmax stay
    in fp32.  The 1/sqrt(head_dim) scale is folded into the q columns of the
    fused qkv weight at parameter-prep time.
    """
    S, D = x_ref.shape[1], x_ref.shape[2]
    hd = D // H
    x = x_ref[0]                                              # [S, D] fp32

    # ---- self-attention (pre-LN, causal) ----
    h = _layernorm(x, ln1w[...], ln1b[...])
    qkv = jnp.dot(h.astype(jnp.bfloat16), wqkv[...],
                  preferred_element_type=jnp.float32) + bqkv[...]       # [S, 3D]

    # head-major [H, S, hd] operands (cheap static stacks; heavy math is batched)
    q = jnp.stack([qkv[:, hh * hd:(hh + 1) * hd]
                   for hh in range(H)], 0).astype(jnp.bfloat16)
    k = jnp.stack([qkv[:, D + hh * hd:D + (hh + 1) * hd]
                   for hh in range(H)], 0).astype(jnp.bfloat16)
    v = jnp.stack([qkv[:, 2 * D + hh * hd:2 * D + (hh + 1) * hd]
                   for hh in range(H)], 0).astype(jnp.bfloat16)

    s = jnp.einsum('hqd,hkd->hqk', q, k,
                   preferred_element_type=jnp.float32)        # [H, S, S] fp32
    s = s + mask_ref[...]                                     # causal bias, bcast over H
    s = s - jnp.max(s, axis=-1, keepdims=True)
    p = jnp.exp(s)
    p = p * pl.reciprocal(jnp.sum(p, axis=-1, keepdims=True), approx=True)

    ctx = jnp.einsum('hqk,hkd->hqd', p.astype(jnp.bfloat16), v,
                     preferred_element_type=jnp.float32)      # [H, S, hd]
    ctx = jnp.concatenate([ctx[hh] for hh in range(H)], axis=-1)    # [S, D] lane-dense
    attn = jnp.dot(ctx.astype(jnp.bfloat16), wo[...],
                   preferred_element_type=jnp.float32) + bo[...]
    x = x + attn

    # ---- MLP (quick_gelu) ----
    h2 = _layernorm(x, ln2w[...], ln2b[...])
    f = jnp.dot(h2.astype(jnp.bfloat16), fc1w[...],
                preferred_element_type=jnp.float32) + fc1b[...]
    f = f * jax.nn.sigmoid(1.702 * f)                         # quick_gelu (CLIP hidden_act)
    f = jnp.dot(f.astype(jnp.bfloat16), fc2w[...],
                preferred_element_type=jnp.float32) + fc2b[...]
    out = x + f

    if do_final_ln:                                           # fused final LayerNorm
        out = _layernorm(out, flnw[...], flnb[...])
    o_ref[0] = out


def encoder_layer(x3d, mask_bias, lp, fln_w, fln_b, *, num_heads, do_final_ln):
    B, S, D = x3d.shape
    kernel = functools.partial(clip_layer_kernel, H=num_heads,
                               do_final_ln=do_final_ln)

    weight_args = [mask_bias,
                   lp['ln1_w'], lp['ln1_b'], lp['wqkv'], lp['bqkv'],
                   lp['wo'], lp['bo'], lp['ln2_w'], lp['ln2_b'],
                   lp['fc1_w'], lp['fc1_b'], lp['fc2_w'], lp['fc2_b'],
                   fln_w, fln_b]

    def resident(a):
        nd = a.ndim
        return pl.BlockSpec(a.shape, lambda b, _nd=nd: (0,) * _nd)   # stays in VMEM

    act_spec = pl.BlockSpec((1, S, D), lambda b: (b, 0, 0))

    return pl.pallas_call(
        kernel,
        out_shape=jax.ShapeDtypeStruct((B, S, D), jnp.float32),
        grid=(B,),
        in_specs=[act_spec] + [resident(a) for a in weight_args],
        out_specs=act_spec,
        input_output_aliases={0: 0},          # write the layer output in place
        compiler_params=pltpu.CompilerParams(
            dimension_semantics=("parallel",)),
    )(x3d, *weight_args)


def init_params(key, V, S, D, I, L, H):
    hd = D // H
    scale = float(hd) ** -0.5
    keys = jax.random.split(key, 4 + L)
    params = {
        'tok_emb': jax.random.normal(keys[0], (V, D), jnp.float32) * 0.02,
        'pos_emb': jax.random.normal(keys[1], (S, D), jnp.float32) * 0.01,
        'final_ln_w': jnp.ones((1, D), jnp.float32),
        'final_ln_b': jnp.zeros((1, D), jnp.float32),
        # module init: torch.nn.Parameter(torch.eye(hidden_dim))
        'text_projection': jnp.eye(D, dtype=jnp.float32),
        'logit_scale': jnp.float32(4.6055),   # unused in forward
        'layers': [],
    }
    for l in range(L):
        ks = jax.random.split(keys[4 + l], 6)
        wq = jax.random.normal(ks[0], (D, D), jnp.float32) * 0.02
        wk = jax.random.normal(ks[1], (D, D), jnp.float32) * 0.02
        wv = jax.random.normal(ks[2], (D, D), jnp.float32) * 0.02
        bq = jnp.zeros((1, D), jnp.float32)
        bk = jnp.zeros((1, D), jnp.float32)
        bv = jnp.zeros((1, D), jnp.float32)
        lp = {
            'ln1_w': jnp.ones((1, D), jnp.float32),
            'ln1_b': jnp.zeros((1, D), jnp.float32),
            # fused qkv; 1/sqrt(hd) folded into the q slice; bf16 for the MXU
            'wqkv': jnp.concatenate([wq * scale, wk, wv], axis=1).astype(jnp.bfloat16),
            'bqkv': jnp.concatenate([bq * scale, bk, bv], axis=1),   # fp32
            'wo': (jax.random.normal(ks[3], (D, D), jnp.float32) * 0.02).astype(jnp.bfloat16),
            'bo': jnp.zeros((1, D), jnp.float32),
            'ln2_w': jnp.ones((1, D), jnp.float32),
            'ln2_b': jnp.zeros((1, D), jnp.float32),
            'fc1_w': (jax.random.normal(ks[4], (D, I), jnp.float32) * 0.02).astype(jnp.bfloat16),
            'fc1_b': jnp.zeros((1, I), jnp.float32),
            'fc2_w': (jax.random.normal(ks[5], (I, D), jnp.float32) * 0.02).astype(jnp.bfloat16),
            'fc2_b': jnp.zeros((1, D), jnp.float32),
        }
        params['layers'].append(lp)
    return params


@functools.partial(jax.jit, static_argnames=('num_heads',))
def sd_clip_forward(tokens, params, *, num_heads):
    """Equivalent of SDClipModelFooocus.forward(tokens) with layer='last'."""
    # TODO(synk): set_up_textual_embeddings (textual-inversion embedding injection)
    # has no static Pallas equivalent; plain integer tokens pass through unchanged.
    # TODO(synk): enable_attention_masks=True padding-mask path not modeled
    # (module default is False); only the causal mask is applied, as in HF CLIP.
    B, S = tokens.shape

    # embeddings stay fp32, as in the module
    x = (params['tok_emb'][tokens] + params['pos_emb'][None, :S, :]).astype(jnp.float32)

    # causal additive bias, hoisted out of the kernels
    mask_bias = jnp.triu(jnp.full((S, S), NEG_BIAS, jnp.float32), k=1)

    n_layers = len(params['layers'])
    for li, lp in enumerate(params['layers']):
        x = encoder_layer(x, mask_bias, lp,
                          params['final_ln_w'], params['final_ln_b'],
                          num_heads=num_heads,
                          do_final_ln=(li == n_layers - 1))

    z = x                                            # final LN fused into the last layer
    # CLIP pooler: hidden state at argmax(token id) (eos), then text_projection.
    eos_idx = jnp.argmax(tokens, axis=-1)
    pooled = z[jnp.arange(B), eos_idx]
    # tiny [B, D] @ [D, D]: plain XLA; a dedicated kernel here is pure launch overhead
    pooled = pooled @ params['text_projection'].astype(jnp.float32)
    return z.astype(jnp.float32), pooled.astype(jnp.float32)


if __name__ == "__main__":
    # small synthetic CLIP text config: vocab=64, seq=8, hidden=32, heads=4,
    # intermediate=128, layers=2, batch=2
    B, S, D, H, I, L, V = 2, 8, 32, 4, 128, 2, 64

    key = jax.random.PRNGKey(0)
    kp, kt = jax.random.split(key)
    params = init_params(kp, V, S, D, I, L, H)

    tokens = jax.random.randint(kt, (B, S), 0, V - 1, dtype=jnp.int32)
    tokens = tokens.at[:, 0].set(V - 2)        # "start"-like token
    tokens = tokens.at[:, -1].set(V - 1)       # "end"/pad token (highest id)

    z, pooled = sd_clip_forward(tokens, params, num_heads=H)
    jax.block_until_ready((z, pooled))

    assert z.shape == (B, S, D) and z.dtype == jnp.float32
    assert pooled.shape == (B, D) and pooled.dtype == jnp.float32
    assert bool(jnp.all(jnp.isfinite(z))) and bool(jnp.all(jnp.isfinite(pooled)))
    print("KERNEL_OK")
</pallas_src>

<mosaic_0001>
module attributes {stable_mosaic.version = 11 : i64} {
  func.func @clip_layer_kernel(%arg0: i32, %arg1: memref<1x8x32xf32, #tpu.memory_space<vmem>>, %arg2: memref<8x8xf32, #tpu.memory_space<vmem>>, %arg3: memref<1x32xf32, #tpu.memory_space<vmem>>, %arg4: memref<1x32xf32, #tpu.memory_space<vmem>>, %arg5: memref<32x96xbf16, #tpu.memory_space<vmem>>, %arg6: memref<1x96xf32, #tpu.memory_space<vmem>>, %arg7: memref<32x32xbf16, #tpu.memory_space<vmem>>, %arg8: memref<1x32xf32, #tpu.memory_space<vmem>>, %arg9: memref<1x32xf32, #tpu.memory_space<vmem>>, %arg10: memref<1x32xf32, #tpu.memory_space<vmem>>, %arg11: memref<32x128xbf16, #tpu.memory_space<vmem>>, %arg12: memref<1x128xf32, #tpu.memory_space<vmem>>, %arg13: memref<128x32xbf16, #tpu.memory_space<vmem>>, %arg14: memref<1x32xf32, #tpu.memory_space<vmem>>, %arg15: memref<1x32xf32, #tpu.memory_space<vmem>>, %arg16: memref<1x32xf32, #tpu.memory_space<vmem>>, %arg17: memref<1x8x32xf32, #tpu.memory_space<vmem>>) attributes {dimension_semantics = [#tpu.dimension_semantics<parallel>], iteration_bounds = array<i64: 2>, scalar_prefetch = 0 : i64, scratch_operands = 0 : i64, tpu.core_type = #tpu.core_type<tc>, window_params = [{transform_indices = @transform_0, window_bounds = array<i64: 1, 8, 32>}, {pipeline_mode = #tpu.pipeline_mode<synchronous>, transform_indices = @transform_1, window_bounds = array<i64: 8, 8>}, {pipeline_mode = #tpu.pipeline_mode<synchronous>, transform_indices = @transform_2, window_bounds = array<i64: 1, 32>}, {pipeline_mode = #tpu.pipeline_mode<synchronous>, transform_indices = @transform_3, window_bounds = array<i64: 1, 32>}, {pipeline_mode = #tpu.pipeline_mode<synchronous>, transform_indices = @transform_4, window_bounds = array<i64: 32, 96>}, {pipeline_mode = #tpu.pipeline_mode<synchronous>, transform_indices = @transform_5, window_bounds = array<i64: 1, 96>}, {pipeline_mode = #tpu.pipeline_mode<synchronous>, transform_indices = @transform_6, window_bounds = array<i64: 32, 32>}, {pipeline_mode = #tpu.pipeline_mode<synchronous>, transform_indices = @transform_7, window_bounds = array<i64: 1, 32>}, {pipeline_mode = #tpu.pipeline_mode<synchronous>, transform_indices = @transform_8, window_bounds = array<i64: 1, 32>}, {pipeline_mode = #tpu.pipeline_mode<synchronous>, transform_indices = @transform_9, window_bounds = array<i64: 1, 32>}, {pipeline_mode = #tpu.pipeline_mode<synchronous>, transform_indices = @transform_10, window_bounds = array<i64: 32, 128>}, {pipeline_mode = #tpu.pipeline_mode<synchronous>, transform_indices = @transform_11, window_bounds = array<i64: 1, 128>}, {pipeline_mode = #tpu.pipeline_mode<synchronous>, transform_indices = @transform_12, window_bounds = array<i64: 128, 32>}, {pipeline_mode = #tpu.pipeline_mode<synchronous>, transform_indices = @transform_13, window_bounds = array<i64: 1, 32>}, {pipeline_mode = #tpu.pipeline_mode<synchronous>, transform_indices = @transform_14, window_bounds = array<i64: 1, 32>}, {pipeline_mode = #tpu.pipeline_mode<synchronous>, transform_indices = @transform_15, window_bounds = array<i64: 1, 32>}, {transform_indices = @transform_16, window_bounds = array<i64: 1, 8, 32>}]} {
    %c0 = arith.constant 0 : index
    %c0_0 = arith.constant 0 : index
    %c0_1 = arith.constant 0 : index
    %0 = vector.load %arg1[%c0, %c0_0, %c0_1] : memref<1x8x32xf32, #tpu.memory_space<vmem>>, vector<1x8x32xf32>
    %1 = vector.shape_cast %0 : vector<1x8x32xf32> to vector<8x32xf32>
    %c0_2 = arith.constant 0 : index
    %c0_3 = arith.constant 0 : index
    %2 = vector.load %arg3[%c0_2, %c0_3] : memref<1x32xf32, #tpu.memory_space<vmem>>, vector<1x32xf32>
    %c0_4 = arith.constant 0 : index
    %c0_5 = arith.constant 0 : index
    %3 = vector.load %arg4[%c0_4, %c0_5] : memref<1x32xf32, #tpu.memory_space<vmem>>, vector<1x32xf32>
    %cst = arith.constant dense<0.000000e+00> : vector<8xf32>
    %4 = vector.multi_reduction <add>, %1, %cst [1] : vector<8x32xf32> to vector<8xf32>
    %5 = vector.shape_cast %4 : vector<8xf32> to vector<8x1xf32>
    %cst_6 = arith.constant 3.200000e+01 : f32
    %6 = vector.broadcast %cst_6 : f32 to vector<8x1xf32>
    %7 = arith.divf %5, %6 : vector<8x1xf32>
    %8 = vector.broadcast %7 : vector<8x1xf32> to vector<8x32xf32>
    %9 = arith.subf %1, %8 : vector<8x32xf32>
    %10 = arith.mulf %9, %9 : vector<8x32xf32>
    %cst_7 = arith.constant dense<0.000000e+00> : vector<8xf32>
    %11 = vector.multi_reduction <add>, %10, %cst_7 [1] : vector<8x32xf32> to vector<8xf32>
    %12 = vector.shape_cast %11 : vector<8xf32> to vector<8x1xf32>
    %cst_8 = arith.constant 3.200000e+01 : f32
    %13 = vector.broadcast %cst_8 : f32 to vector<8x1xf32>
    %14 = arith.divf %12, %13 : vector<8x1xf32>
    %15 = vector.broadcast %7 : vector<8x1xf32> to vector<8x32xf32>
    %16 = arith.subf %1, %15 : vector<8x32xf32>
    %cst_9 = arith.constant 9.99999974E-6 : f32
    %17 = vector.broadcast %cst_9 : f32 to vector<8x1xf32>
    %18 = arith.addf %14, %17 : vector<8x1xf32>
    %19 = math.rsqrt %18 : vector<8x1xf32>
    %20 = vector.broadcast %19 : vector<8x1xf32> to vector<8x32xf32>
    %21 = arith.mulf %16, %20 : vector<8x32xf32>
    %22 = vector.broadcast %2 : vector<1x32xf32> to vector<8x32xf32>
    %23 = arith.mulf %21, %22 : vector<8x32xf32>
    %24 = vector.broadcast %3 : vector<1x32xf32> to vector<8x32xf32>
    %25 = arith.addf %23, %24 : vector<8x32xf32>
    %26 = arith.truncf %25 : vector<8x32xf32> to vector<8x32xbf16>
    %c0_10 = arith.constant 0 : index
    %c0_11 = arith.constant 0 : index
    %27 = vector.load %arg5[%c0_10, %c0_11] : memref<32x96xbf16, #tpu.memory_space<vmem>>, vector<32x96xbf16>
    %cst_12 = arith.constant dense<0.000000e+00> : vector<8x96xf32>
    %28 = tpu.matmul %26, %27, %cst_12 {dimension_numbers = #tpu.dot_dimension_numbers<[1], [0], [0], [1], [0, 0, 1, 1], [], []>} : vector<8x32xbf16>, vector<32x96xbf16>, vector<8x96xf32> -> vector<8x96xf32>
    %c0_13 = arith.constant 0 : index
    %c0_14 = arith.constant 0 : index
    %29 = vector.load %arg6[%c0_13, %c0_14] : memref<1x96xf32, #tpu.memory_space<vmem>>, vector<1x96xf32>
    %30 = vector.broadcast %29 : vector<1x96xf32> to vector<8x96xf32>
    %31 = arith.addf %28, %30 : vector<8x96xf32>
    %32 = vector.extract_strided_slice %31 {offsets = [0, 0], sizes = [8, 8], strides = [1, 1]} : vector<8x96xf32> to vector<8x8xf32>
    %33 = vector.extract_strided_slice %31 {offsets = [0, 8], sizes = [8, 8], strides = [1, 1]} : vector<8x96xf32> to vector<8x8xf32>
    %34 = vector.extract_strided_slice %31 {offsets = [0, 16], sizes = [8, 8], strides = [1, 1]} : vector<8x96xf32> to vector<8x8xf32>
    %35 = vector.extract_strided_slice %31 {offsets = [0, 24], sizes = [8, 8], strides = [1, 1]} : vector<8x96xf32> to vector<8x8xf32>
    %36 = vector.shape_cast %32 : vector<8x8xf32> to vector<1x8x8xf32>
    %37 = vector.shape_cast %33 : vector<8x8xf32> to vector<1x8x8xf32>
    %38 = vector.shape_cast %34 : vector<8x8xf32> to vector<1x8x8xf32>
    %39 = vector.shape_cast %35 : vector<8x8xf32> to vector<1x8x8xf32>
    %40 = tpu.concatenate %36, %37, %38, %39 in 0 : vector<1x8x8xf32>, vector<1x8x8xf32>, vector<1x8x8xf32>, vector<1x8x8xf32> -> vector<4x8x8xf32>
    %41 = arith.truncf %40 : vector<4x8x8xf32> to vector<4x8x8xbf16>
    %42 = vector.extract_strided_slice %31 {offsets = [0, 32], sizes = [8, 8], strides = [1, 1]} : vector<8x96xf32> to vector<8x8xf32>
    %43 = vector.extract_strided_slice %31 {offsets = [0, 40], sizes = [8, 8], strides = [1, 1]} : vector<8x96xf32> to vector<8x8xf32>
    %44 = vector.extract_strided_slice %31 {offsets = [0, 48], sizes = [8, 8], strides = [1, 1]} : vector<8x96xf32> to vector<8x8xf32>
    %45 = vector.extract_strided_slice %31 {offsets = [0, 56], sizes = [8, 8], strides = [1, 1]} : vector<8x96xf32> to vector<8x8xf32>
    %46 = vector.shape_cast %42 : vector<8x8xf32> to vector<1x8x8xf32>
    %47 = vector.shape_cast %43 : vector<8x8xf32> to vector<1x8x8xf32>
    %48 = vector.shape_cast %44 : vector<8x8xf32> to vector<1x8x8xf32>
    %49 = vector.shape_cast %45 : vector<8x8xf32> to vector<1x8x8xf32>
    %50 = tpu.concatenate %46, %47, %48, %49 in 0 : vector<1x8x8xf32>, vector<1x8x8xf32>, vector<1x8x8xf32>, vector<1x8x8xf32> -> vector<4x8x8xf32>
    %51 = arith.truncf %50 : vector<4x8x8xf32> to vector<4x8x8xbf16>
    %52 = vector.extract_strided_slice %31 {offsets = [0, 64], sizes = [8, 8], strides = [1, 1]} : vector<8x96xf32> to vector<8x8xf32>
    %53 = vector.extract_strided_slice %31 {offsets = [0, 72], sizes = [8, 8], strides = [1, 1]} : vector<8x96xf32> to vector<8x8xf32>
    %54 = vector.extract_strided_slice %31 {offsets = [0, 80], sizes = [8, 8], strides = [1, 1]} : vector<8x96xf32> to vector<8x8xf32>
    %55 = vector.extract_strided_slice %31 {offsets = [0, 88], sizes = [8, 8], strides = [1, 1]} : vector<8x96xf32> to vector<8x8xf32>
    %56 = vector.shape_cast %52 : vector<8x8xf32> to vector<1x8x8xf32>
    %57 = vector.shape_cast %53 : vector<8x8xf32> to vector<1x8x8xf32>
    %58 = vector.shape_cast %54 : vector<8x8xf32> to vector<1x8x8xf32>
    %59 = vector.shape_cast %55 : vector<8x8xf32> to vector<1x8x8xf32>
    %60 = tpu.concatenate %56, %57, %58, %59 in 0 : vector<1x8x8xf32>, vector<1x8x8xf32>, vector<1x8x8xf32>, vector<1x8x8xf32> -> vector<4x8x8xf32>
    %61 = arith.truncf %60 : vector<4x8x8xf32> to vector<4x8x8xbf16>
    "tpu.trace_start"() <{level = 10 : i32, message = "hqd,hkd->hqk"}> : () -> ()
    %cst_15 = arith.constant dense<0.000000e+00> : vector<4x8x8xf32>
    %62 = tpu.matmul %41, %51, %cst_15 {dimension_numbers = #tpu.dot_dimension_numbers<[2], [2], [1], [1], [0, 0, 0, 1, 1, 1], [0], [0]>} : vector<4x8x8xbf16>, vector<4x8x8xbf16>, vector<4x8x8xf32> -> vector<4x8x8xf32>
    "tpu.trace_stop"() : () -> ()
    %c0_16 = arith.constant 0 : index
    %c0_17 = arith.constant 0 : index
    %63 = vector.load %arg2[%c0_16, %c0_17] : memref<8x8xf32, #tpu.memory_space<vmem>>, vector<8x8xf32>
    %64 = vector.shape_cast %63 : vector<8x8xf32> to vector<1x8x8xf32>
    %65 = vector.broadcast %64 : vector<1x8x8xf32> to vector<4x8x8xf32>
    %66 = arith.addf %62, %65 : vector<4x8x8xf32>
    %cst_18 = arith.constant dense<0xFF800000> : vector<4x8xf32>
    %67 = vector.multi_reduction <maximumf>, %66, %cst_18 [2] : vector<4x8x8xf32> to vector<4x8xf32>
    %68 = vector.shape_cast %67 : vector<4x8xf32> to vector<4x8x1xf32>
    %69 = vector.broadcast %68 : vector<4x8x1xf32> to vector<4x8x8xf32>
    %70 = arith.subf %66, %69 : vector<4x8x8xf32>
    %71 = math.exp %70 : vector<4x8x8xf32>
    %cst_19 = arith.constant dense<0.000000e+00> : vector<4x8xf32>
    %72 = vector.multi_reduction <add>, %71, %cst_19 [2] : vector<4x8x8xf32> to vector<4x8xf32>
    %73 = vector.shape_cast %72 : vector<4x8xf32> to vector<4x8x1xf32>
    %74 = tpu.reciprocal %73 {approx = true} : vector<4x8x1xf32> -> vector<4x8x1xf32>
    %75 = vector.broadcast %74 : vector<4x8x1xf32> to vector<4x8x8xf32>
    %76 = arith.mulf %71, %75 : vector<4x8x8xf32>
    %77 = arith.truncf %76 : vector<4x8x8xf32> to vector<4x8x8xbf16>
    "tpu.trace_start"() <{level = 10 : i32, message = "hqk,hkd->hqd"}> : () -> ()
    %cst_20 = arith.constant dense<0.000000e+00> : vector<4x8x8xf32>
    %78 = tpu.matmul %77, %61, %cst_20 {dimension_numbers = #tpu.dot_dimension_numbers<[2], [1], [1], [2], [0, 0, 0, 1, 1, 2], [0], [0]>} : vector<4x8x8xbf16>, vector<4x8x8xbf16>, vector<4x8x8xf32> -> vector<4x8x8xf32>
    "tpu.trace_stop"() : () -> ()
    %79 = vector.extract_strided_slice %78 {offsets = [0, 0, 0], sizes = [1, 8, 8], strides = [1, 1, 1]} : vector<4x8x8xf32> to vector<1x8x8xf32>
    %80 = vector.shape_cast %79 : vector<1x8x8xf32> to vector<8x8xf32>
    %81 = vector.extract_strided_slice %78 {offsets = [1, 0, 0], sizes = [1, 8, 8], strides = [1, 1, 1]} : vector<4x8x8xf32> to vector<1x8x8xf32>
    %82 = vector.shape_cast %81 : vector<1x8x8xf32> to vector<8x8xf32>
    %83 = vector.extract_strided_slice %78 {offsets = [2, 0, 0], sizes = [1, 8, 8], strides = [1, 1, 1]} : vector<4x8x8xf32> to vector<1x8x8xf32>
    %84 = vector.shape_cast %83 : vector<1x8x8xf32> to vector<8x8xf32>
    %85 = vector.extract_strided_slice %78 {offsets = [3, 0, 0], sizes = [1, 8, 8], strides = [1, 1, 1]} : vector<4x8x8xf32> to vector<1x8x8xf32>
    %86 = vector.shape_cast %85 : vector<1x8x8xf32> to vector<8x8xf32>
    %87 = tpu.concatenate %80, %82, %84, %86 in 1 : vector<8x8xf32>, vector<8x8xf32>, vector<8x8xf32>, vector<8x8xf32> -> vector<8x32xf32>
    %88 = arith.truncf %87 : vector<8x32xf32> to vector<8x32xbf16>
    %c0_21 = arith.constant 0 : index
    %c0_22 = arith.constant 0 : index
    %89 = vector.load %arg7[%c0_21, %c0_22] : memref<32x32xbf16, #tpu.memory_space<vmem>>, vector<32x32xbf16>
    %cst_23 = arith.constant dense<0.000000e+00> : vector<8x32xf32>
    %90 = tpu.matmul %88, %89, %cst_23 {dimension_numbers = #tpu.dot_dimension_numbers<[1], [0], [0], [1], [0, 0, 1, 1], [], []>} : vector<8x32xbf16>, vector<32x32xbf16>, vector<8x32xf32> -> vector<8x32xf32>
    %c0_24 = arith.constant 0 : index
    %c0_25 = arith.constant 0 : index
    %91 = vector.load %arg8[%c0_24, %c0_25] : memref<1x32xf32, #tpu.memory_space<vmem>>, vector<1x32xf32>
    %92 = vector.broadcast %91 : vector<1x32xf32> to vector<8x32xf32>
    %93 = arith.addf %90, %92 : vector<8x32xf32>
    %94 = arith.addf %1, %93 : vector<8x32xf32>
    %c0_26 = arith.constant 0 : index
    %c0_27 = arith.constant 0 : index
    %95 = vector.load %arg9[%c0_26, %c0_27] : memref<1x32xf32, #tpu.memory_space<vmem>>, vector<1x32xf32>
    %c0_28 = arith.constant 0 : index
    %c0_29 = arith.constant 0 : index
    %96 = vector.load %arg10[%c0_28, %c0_29] : memref<1x32xf32, #tpu.memory_space<vmem>>, vector<1x32xf32>
    %cst_30 = arith.constant dense<0.000000e+00> : vector<8xf32>
    %97 = vector.multi_reduction <add>, %94, %cst_30 [1] : vector<8x32xf32> to vector<8xf32>
    %98 = vector.shape_cast %97 : vector<8xf32> to vector<8x1xf32>
    %cst_31 = arith.constant 3.200000e+01 : f32
    %99 = vector.broadcast %cst_31 : f32 to vector<8x1xf32>
    %100 = arith.divf %98, %99 : vector<8x1xf32>
    %101 = vector.broadcast %100 : vector<8x1xf32> to vector<8x32xf32>
    %102 = arith.subf %94, %101 : vector<8x32xf32>
    %103 = arith.mulf %102, %102 : vector<8x32xf32>
    %cst_32 = arith.constant dense<0.000000e+00> : vector<8xf32>
    %104 = vector.multi_reduction <add>, %103, %cst_32 [1] : vector<8x32xf32> to vector<8xf32>
    %105 = vector.shape_cast %104 : vector<8xf32> to vector<8x1xf32>
    %cst_33 = arith.constant 3.200000e+01 : f32
    %106 = vector.broadcast %cst_33 : f32 to vector<8x1xf32>
    %107 = arith.divf %105, %106 : vector<8x1xf32>
    %108 = vector.broadcast %100 : vector<8x1xf32> to vector<8x32xf32>
    %109 = arith.subf %94, %108 : vector<8x32xf32>
    %cst_34 = arith.constant 9.99999974E-6 : f32
    %110 = vector.broadcast %cst_34 : f32 to vector<8x1xf32>
    %111 = arith.addf %107, %110 : vector<8x1xf32>
    %112 = math.rsqrt %111 : vector<8x1xf32>
    %113 = vector.broadcast %112 : vector<8x1xf32> to vector<8x32xf32>
    %114 = arith.mulf %109, %113 : vector<8x32xf32>
    %115 = vector.broadcast %95 : vector<1x32xf32> to vector<8x32xf32>
    %116 = arith.mulf %114, %115 : vector<8x32xf32>
    %117 = vector.broadcast %96 : vector<1x32xf32> to vector<8x32xf32>
    %118 = arith.addf %116, %117 : vector<8x32xf32>
    %119 = arith.truncf %118 : vector<8x32xf32> to vector<8x32xbf16>
    %c0_35 = arith.constant 0 : index
    %c0_36 = arith.constant 0 : index
    %120 = vector.load %arg11[%c0_35, %c0_36] : memref<32x128xbf16, #tpu.memory_space<vmem>>, vector<32x128xbf16>
    %cst_37 = arith.constant dense<0.000000e+00> : vector<8x128xf32>
    %121 = tpu.matmul %119, %120, %cst_37 {dimension_numbers = #tpu.dot_dimension_numbers<[1], [0], [0], [1], [0, 0, 1, 1], [], []>} : vector<8x32xbf16>, vector<32x128xbf16>, vector<8x128xf32> -> vector<8x128xf32>
    %c0_38 = arith.constant 0 : index
    %c0_39 = arith.constant 0 : index
    %122 = vector.load %arg12[%c0_38, %c0_39] : memref<1x128xf32, #tpu.memory_space<vmem>>, vector<1x128xf32>
    %123 = vector.broadcast %122 : vector<1x128xf32> to vector<8x128xf32>
    %124 = arith.addf %121, %123 : vector<8x128xf32>
    %cst_40 = arith.constant 1.702000e+00 : f32
    %125 = vector.broadcast %cst_40 : f32 to vector<8x128xf32>
    %126 = arith.mulf %125, %124 : vector<8x128xf32>
    %127 = arith.negf %126 : vector<8x128xf32>
    %128 = math.exp %127 : vector<8x128xf32>
    %cst_41 = arith.constant 1.000000e+00 : f32
    %129 = vector.broadcast %cst_41 : f32 to vector<8x128xf32>
    %130 = arith.addf %129, %128 : vector<8x128xf32>
    %131 = arith.divf %129, %130 : vector<8x128xf32>
    %132 = arith.mulf %124, %131 : vector<8x128xf32>
    %133 = arith.truncf %132 : vector<8x128xf32> to vector<8x128xbf16>
    %c0_42 = arith.constant 0 : index
    %c0_43 = arith.constant 0 : index
    %134 = vector.load %arg13[%c0_42, %c0_43] : memref<128x32xbf16, #tpu.memory_space<vmem>>, vector<128x32xbf16>
    %cst_44 = arith.constant dense<0.000000e+00> : vector<8x32xf32>
    %135 = tpu.matmul %133, %134, %cst_44 {dimension_numbers = #tpu.dot_dimension_numbers<[1], [0], [0], [1], [0, 0, 1, 1], [], []>} : vector<8x128xbf16>, vector<128x32xbf16>, vector<8x32xf32> -> vector<8x32xf32>
    %c0_45 = arith.constant 0 : index
    %c0_46 = arith.constant 0 : index
    %136 = vector.load %arg14[%c0_45, %c0_46] : memref<1x32xf32, #tpu.memory_space<vmem>>, vector<1x32xf32>
    %137 = vector.broadcast %136 : vector<1x32xf32> to vector<8x32xf32>
    %138 = arith.addf %135, %137 : vector<8x32xf32>
    %139 = arith.addf %94, %138 : vector<8x32xf32>
    %c0_47 = arith.constant 0 : index
    %c0_48 = arith.constant 0 : index
    %c0_49 = arith.constant 0 : index
    %140 = vector.load %arg17[%c0_47, %c0_48, %c0_49] : memref<1x8x32xf32, #tpu.memory_space<vmem>>, vector<1x8x32xf32>
    %141 = vector.shape_cast %140 : vector<1x8x32xf32> to vector<8x32xf32>
    %142 = vector.shape_cast %139 : vector<8x32xf32> to vector<1x8x32xf32>
    tpu.vector_store %arg17[%c0_47, %c0_48, %c0_49], %142 {strides = array<i32>} : memref<1x8x32xf32, #tpu.memory_space<vmem>>, vector<1x8x32xf32>,
    return
  }
  func.func @transform_0(%arg0: i32) -> (i32, i32, i32) {
    %c0_i32 = arith.constant 0 : i32
    %c0_i32_0 = arith.constant 0 : i32
    %c0_i32_1 = arith.constant 0 : i32
    return %arg0, %c0_i32, %c0_i32_0 : i32, i32, i32
  }
  func.func @transform_1(%arg0: i32) -> (i32, i32) {
    %c0_i32 = arith.constant 0 : i32
    %c0_i32_0 = arith.constant 0 : i32
    %c0_i32_1 = arith.constant 0 : i32
    return %c0_i32, %c0_i32_0 : i32, i32
  }
  func.func @transform_2(%arg0: i32) -> (i32, i32) {
    %c0_i32 = arith.constant 0 : i32
    %c0_i32_0 = arith.constant 0 : i32
    %c0_i32_1 = arith.constant 0 : i32
    return %c0_i32, %c0_i32_0 : i32, i32
  }
  func.func @transform_3(%arg0: i32) -> (i32, i32) {
    %c0_i32 = arith.constant 0 : i32
    %c0_i32_0 = arith.constant 0 : i32
    %c0_i32_1 = arith.constant 0 : i32
    return %c0_i32, %c0_i32_0 : i32, i32
  }
  func.func @transform_4(%arg0: i32) -> (i32, i32) {
    %c0_i32 = arith.constant 0 : i32
    %c0_i32_0 = arith.constant 0 : i32
    %c0_i32_1 = arith.constant 0 : i32
    return %c0_i32, %c0_i32_0 : i32, i32
  }
  func.func @transform_5(%arg0: i32) -> (i32, i32) {
    %c0_i32 = arith.constant 0 : i32
    %c0_i32_0 = arith.constant 0 : i32
    %c0_i32_1 = arith.constant 0 : i32
    return %c0_i32, %c0_i32_0 : i32, i32
  }
  func.func @transform_6(%arg0: i32) -> (i32, i32) {
    %c0_i32 = arith.constant 0 : i32
    %c0_i32_0 = arith.constant 0 : i32
    %c0_i32_1 = arith.constant 0 : i32
    return %c0_i32, %c0_i32_0 : i32, i32
  }
  func.func @transform_7(%arg0: i32) -> (i32, i32) {
    %c0_i32 = arith.constant 0 : i32
    %c0_i32_0 = arith.constant 0 : i32
    %c0_i32_1 = arith.constant 0 : i32
    return %c0_i32, %c0_i32_0 : i32, i32
  }
  func.func @transform_8(%arg0: i32) -> (i32, i32) {
    %c0_i32 = arith.constant 0 : i32
    %c0_i32_0 = arith.constant 0 : i32
    %c0_i32_1 = arith.constant 0 : i32
    return %c0_i32, %c0_i32_0 : i32, i32
  }
  func.func @transform_9(%arg0: i32) -> (i32, i32) {
    %c0_i32 = arith.constant 0 : i32
    %c0_i32_0 = arith.constant 0 : i32
    %c0_i32_1 = arith.constant 0 : i32
    return %c0_i32, %c0_i32_0 : i32, i32
  }
  func.func @transform_10(%arg0: i32) -> (i32, i32) {
    %c0_i32 = arith.constant 0 : i32
    %c0_i32_0 = arith.constant 0 : i32
    %c0_i32_1 = arith.constant 0 : i32
    return %c0_i32, %c0_i32_0 : i32, i32
  }
  func.func @transform_11(%arg0: i32) -> (i32, i32) {
    %c0_i32 = arith.constant 0 : i32
    %c0_i32_0 = arith.constant 0 : i32
    %c0_i32_1 = arith.constant 0 : i32
    return %c0_i32, %c0_i32_0 : i32, i32
  }
  func.func @transform_12(%arg0: i32) -> (i32, i32) {
    %c0_i32 = arith.constant 0 : i32
    %c0_i32_0 = arith.constant 0 : i32
    %c0_i32_1 = arith.constant 0 : i32
    return %c0_i32, %c0_i32_0 : i32, i32
  }
  func.func @transform_13(%arg0: i32) -> (i32, i32) {
    %c0_i32 = arith.constant 0 : i32
    %c0_i32_0 = arith.constant 0 : i32
    %c0_i32_1 = arith.constant 0 : i32
    return %c0_i32, %c0_i32_0 : i32, i32
  }
  func.func @transform_14(%arg0: i32) -> (i32, i32) {
    %c0_i32 = arith.constant 0 : i32
    %c0_i32_0 = arith.constant 0 : i32
    %c0_i32_1 = arith.constant 0 : i32
    return %c0_i32, %c0_i32_0 : i32, i32
  }
  func.func @transform_15(%arg0: i32) -> (i32, i32) {
    %c0_i32 = arith.constant 0 : i32
    %c0_i32_0 = arith.constant 0 : i32
    %c0_i32_1 = arith.constant 0 : i32
    return %c0_i32, %c0_i32_0 : i32, i32
  }
  func.func @transform_16(%arg0: i32) -> (i32, i32, i32) {
    %c0_i32 = arith.constant 0 : i32
    %c0_i32_0 = arith.constant 0 : i32
    %c0_i32_1 = arith.constant 0 : i32
    return %arg0, %c0_i32, %c0_i32_0 : i32, i32, i32
  }
}

module attributes {stable_mosaic.version = 11 : i64} {
  func.func @clip_layer_kernel(%arg0: i32, %arg1: memref<1x8x32xf32, #tpu.memory_space<vmem>>, %arg2: memref<8x8xf32, #tpu.memory_space<vmem>>, %arg3: memref<1x32xf32, #tpu.memory_space<vmem>>, %arg4: memref<1x32xf32, #tpu.memory_space<vmem>>, %arg5: memref<32x96xbf16, #tpu.memory_space<vmem>>, %arg6: memref<1x96xf32, #tpu.memory_space<vmem>>, %arg7: memref<32x32xbf16, #tpu.memory_space<vmem>>, %arg8: memref<1x32xf32, #tpu.memory_space<vmem>>, %arg9: memref<1x32xf32, #tpu.memory_space<vmem>>, %arg10: memref<1x32xf32, #tpu.memory_space<vmem>>, %arg11: memref<32x128xbf16, #tpu.memory_space<vmem>>, %arg12: memref<1x128xf32, #tpu.memory_space<vmem>>, %arg13: memref<128x32xbf16, #tpu.memory_space<vmem>>, %arg14: memref<1x32xf32, #tpu.memory_space<vmem>>, %arg15: memref<1x32xf32, #tpu.memory_space<vmem>>, %arg16: memref<1x32xf32, #tpu.memory_space<vmem>>, %arg17: memref<1x8x32xf32, #tpu.memory_space<vmem>>) attributes {dimension_semantics = [#tpu.dimension_semantics<parallel>], iteration_bounds = array<i64: 2>, scalar_prefetch = 0 : i64, scratch_operands = 0 : i64, tpu.core_type = #tpu.core_type<tc>, window_params = [{transform_indices = @transform_0, window_bounds = array<i64: 1, 8, 32>}, {pipeline_mode = #tpu.pipeline_mode<synchronous>, transform_indices = @transform_1, window_bounds = array<i64: 8, 8>}, {pipeline_mode = #tpu.pipeline_mode<synchronous>, transform_indices = @transform_2, window_bounds = array<i64: 1, 32>}, {pipeline_mode = #tpu.pipeline_mode<synchronous>, transform_indices = @transform_3, window_bounds = array<i64: 1, 32>}, {pipeline_mode = #tpu.pipeline_mode<synchronous>, transform_indices = @transform_4, window_bounds = array<i64: 32, 96>}, {pipeline_mode = #tpu.pipeline_mode<synchronous>, transform_indices = @transform_5, window_bounds = array<i64: 1, 96>}, {pipeline_mode = #tpu.pipeline_mode<synchronous>, transform_indices = @transform_6, window_bounds = array<i64: 32, 32>}, {pipeline_mode = #tpu.pipeline_mode<synchronous>, transform_indices = @transform_7, window_bounds = array<i64: 1, 32>}, {pipeline_mode = #tpu.pipeline_mode<synchronous>, transform_indices = @transform_8, window_bounds = array<i64: 1, 32>}, {pipeline_mode = #tpu.pipeline_mode<synchronous>, transform_indices = @transform_9, window_bounds = array<i64: 1, 32>}, {pipeline_mode = #tpu.pipeline_mode<synchronous>, transform_indices = @transform_10, window_bounds = array<i64: 32, 128>}, {pipeline_mode = #tpu.pipeline_mode<synchronous>, transform_indices = @transform_11, window_bounds = array<i64: 1, 128>}, {pipeline_mode = #tpu.pipeline_mode<synchronous>, transform_indices = @transform_12, window_bounds = array<i64: 128, 32>}, {pipeline_mode = #tpu.pipeline_mode<synchronous>, transform_indices = @transform_13, window_bounds = array<i64: 1, 32>}, {pipeline_mode = #tpu.pipeline_mode<synchronous>, transform_indices = @transform_14, window_bounds = array<i64: 1, 32>}, {pipeline_mode = #tpu.pipeline_mode<synchronous>, transform_indices = @transform_15, window_bounds = array<i64: 1, 32>}, {transform_indices = @transform_16, window_bounds = array<i64: 1, 8, 32>}]} {
    %c0 = arith.constant 0 : index
    %c0_0 = arith.constant 0 : index
    %c0_1 = arith.constant 0 : index
    %0 = vector.load %arg1[%c0, %c0_0, %c0_1] : memref<1x8x32xf32, #tpu.memory_space<vmem>>, vector<1x8x32xf32>
    %1 = vector.shape_cast %0 : vector<1x8x32xf32> to vector<8x32xf32>
    %c0_2 = arith.constant 0 : index
    %c0_3 = arith.constant 0 : index
    %2 = vector.load %arg3[%c0_2, %c0_3] : memref<1x32xf32, #tpu.memory_space<vmem>>, vector<1x32xf32>
    %c0_4 = arith.constant 0 : index
    %c0_5 = arith.constant 0 : index
    %3 = vector.load %arg4[%c0_4, %c0_5] : memref<1x32xf32, #tpu.memory_space<vmem>>, vector<1x32xf32>
    %cst = arith.constant dense<0.000000e+00> : vector<8xf32>
    %4 = vector.multi_reduction <add>, %1, %cst [1] : vector<8x32xf32> to vector<8xf32>
    %5 = vector.shape_cast %4 : vector<8xf32> to vector<8x1xf32>
    %cst_6 = arith.constant 3.200000e+01 : f32
    %6 = vector.broadcast %cst_6 : f32 to vector<8x1xf32>
    %7 = arith.divf %5, %6 : vector<8x1xf32>
    %8 = vector.broadcast %7 : vector<8x1xf32> to vector<8x32xf32>
    %9 = arith.subf %1, %8 : vector<8x32xf32>
    %10 = arith.mulf %9, %9 : vector<8x32xf32>
    %cst_7 = arith.constant dense<0.000000e+00> : vector<8xf32>
    %11 = vector.multi_reduction <add>, %10, %cst_7 [1] : vector<8x32xf32> to vector<8xf32>
    %12 = vector.shape_cast %11 : vector<8xf32> to vector<8x1xf32>
    %cst_8 = arith.constant 3.200000e+01 : f32
    %13 = vector.broadcast %cst_8 : f32 to vector<8x1xf32>
    %14 = arith.divf %12, %13 : vector<8x1xf32>
    %15 = vector.broadcast %7 : vector<8x1xf32> to vector<8x32xf32>
    %16 = arith.subf %1, %15 : vector<8x32xf32>
    %cst_9 = arith.constant 9.99999974E-6 : f32
    %17 = vector.broadcast %cst_9 : f32 to vector<8x1xf32>
    %18 = arith.addf %14, %17 : vector<8x1xf32>
    %19 = math.rsqrt %18 : vector<8x1xf32>
    %20 = vector.broadcast %19 : vector<8x1xf32> to vector<8x32xf32>
    %21 = arith.mulf %16, %20 : vector<8x32xf32>
    %22 = vector.broadcast %2 : vector<1x32xf32> to vector<8x32xf32>
    %23 = arith.mulf %21, %22 : vector<8x32xf32>
    %24 = vector.broadcast %3 : vector<1x32xf32> to vector<8x32xf32>
    %25 = arith.addf %23, %24 : vector<8x32xf32>
    %26 = arith.truncf %25 : vector<8x32xf32> to vector<8x32xbf16>
    %c0_10 = arith.constant 0 : index
    %c0_11 = arith.constant 0 : index
    %27 = vector.load %arg5[%c0_10, %c0_11] : memref<32x96xbf16, #tpu.memory_space<vmem>>, vector<32x96xbf16>
    %cst_12 = arith.constant dense<0.000000e+00> : vector<8x96xf32>
    %28 = tpu.matmul %26, %27, %cst_12 {dimension_numbers = #tpu.dot_dimension_numbers<[1], [0], [0], [1], [0, 0, 1, 1], [], []>} : vector<8x32xbf16>, vector<32x96xbf16>, vector<8x96xf32> -> vector<8x96xf32>
    %c0_13 = arith.constant 0 : index
    %c0_14 = arith.constant 0 : index
    %29 = vector.load %arg6[%c0_13, %c0_14] : memref<1x96xf32, #tpu.memory_space<vmem>>, vector<1x96xf32>
    %30 = vector.broadcast %29 : vector<1x96xf32> to vector<8x96xf32>
    %31 = arith.addf %28, %30 : vector<8x96xf32>
    %32 = vector.extract_strided_slice %31 {offsets = [0, 0], sizes = [8, 8], strides = [1, 1]} : vector<8x96xf32> to vector<8x8xf32>
    %33 = vector.extract_strided_slice %31 {offsets = [0, 8], sizes = [8, 8], strides = [1, 1]} : vector<8x96xf32> to vector<8x8xf32>
    %34 = vector.extract_strided_slice %31 {offsets = [0, 16], sizes = [8, 8], strides = [1, 1]} : vector<8x96xf32> to vector<8x8xf32>
    %35 = vector.extract_strided_slice %31 {offsets = [0, 24], sizes = [8, 8], strides = [1, 1]} : vector<8x96xf32> to vector<8x8xf32>
    %36 = vector.shape_cast %32 : vector<8x8xf32> to vector<1x8x8xf32>
    %37 = vector.shape_cast %33 : vector<8x8xf32> to vector<1x8x8xf32>
    %38 = vector.shape_cast %34 : vector<8x8xf32> to vector<1x8x8xf32>
    %39 = vector.shape_cast %35 : vector<8x8xf32> to vector<1x8x8xf32>
    %40 = tpu.concatenate %36, %37, %38, %39 in 0 : vector<1x8x8xf32>, vector<1x8x8xf32>, vector<1x8x8xf32>, vector<1x8x8xf32> -> vector<4x8x8xf32>
    %41 = arith.truncf %40 : vector<4x8x8xf32> to vector<4x8x8xbf16>
    %42 = vector.extract_strided_slice %31 {offsets = [0, 32], sizes = [8, 8], strides = [1, 1]} : vector<8x96xf32> to vector<8x8xf32>
    %43 = vector.extract_strided_slice %31 {offsets = [0, 40], sizes = [8, 8], strides = [1, 1]} : vector<8x96xf32> to vector<8x8xf32>
    %44 = vector.extract_strided_slice %31 {offsets = [0, 48], sizes = [8, 8], strides = [1, 1]} : vector<8x96xf32> to vector<8x8xf32>
    %45 = vector.extract_strided_slice %31 {offsets = [0, 56], sizes = [8, 8], strides = [1, 1]} : vector<8x96xf32> to vector<8x8xf32>
    %46 = vector.shape_cast %42 : vector<8x8xf32> to vector<1x8x8xf32>
    %47 = vector.shape_cast %43 : vector<8x8xf32> to vector<1x8x8xf32>
    %48 = vector.shape_cast %44 : vector<8x8xf32> to vector<1x8x8xf32>
    %49 = vector.shape_cast %45 : vector<8x8xf32> to vector<1x8x8xf32>
    %50 = tpu.concatenate %46, %47, %48, %49 in 0 : vector<1x8x8xf32>, vector<1x8x8xf32>, vector<1x8x8xf32>, vector<1x8x8xf32> -> vector<4x8x8xf32>
    %51 = arith.truncf %50 : vector<4x8x8xf32> to vector<4x8x8xbf16>
    %52 = vector.extract_strided_slice %31 {offsets = [0, 64], sizes = [8, 8], strides = [1, 1]} : vector<8x96xf32> to vector<8x8xf32>
    %53 = vector.extract_strided_slice %31 {offsets = [0, 72], sizes = [8, 8], strides = [1, 1]} : vector<8x96xf32> to vector<8x8xf32>
    %54 = vector.extract_strided_slice %31 {offsets = [0, 80], sizes = [8, 8], strides = [1, 1]} : vector<8x96xf32> to vector<8x8xf32>
    %55 = vector.extract_strided_slice %31 {offsets = [0, 88], sizes = [8, 8], strides = [1, 1]} : vector<8x96xf32> to vector<8x8xf32>
    %56 = vector.shape_cast %52 : vector<8x8xf32> to vector<1x8x8xf32>
    %57 = vector.shape_cast %53 : vector<8x8xf32> to vector<1x8x8xf32>
    %58 = vector.shape_cast %54 : vector<8x8xf32> to vector<1x8x8xf32>
    %59 = vector.shape_cast %55 : vector<8x8xf32> to vector<1x8x8xf32>
    %60 = tpu.concatenate %56, %57, %58, %59 in 0 : vector<1x8x8xf32>, vector<1x8x8xf32>, vector<1x8x8xf32>, vector<1x8x8xf32> -> vector<4x8x8xf32>
    %61 = arith.truncf %60 : vector<4x8x8xf32> to vector<4x8x8xbf16>
    "tpu.trace_start"() <{level = 10 : i32, message = "hqd,hkd->hqk"}> : () -> ()
    %cst_15 = arith.constant dense<0.000000e+00> : vector<4x8x8xf32>
    %62 = tpu.matmul %41, %51, %cst_15 {dimension_numbers = #tpu.dot_dimension_numbers<[2], [2], [1], [1], [0, 0, 0, 1, 1, 1], [0], [0]>} : vector<4x8x8xbf16>, vector<4x8x8xbf16>, vector<4x8x8xf32> -> vector<4x8x8xf32>
    "tpu.trace_stop"() : () -> ()
    %c0_16 = arith.constant 0 : index
    %c0_17 = arith.constant 0 : index
    %63 = vector.load %arg2[%c0_16, %c0_17] : memref<8x8xf32, #tpu.memory_space<vmem>>, vector<8x8xf32>
    %64 = vector.shape_cast %63 : vector<8x8xf32> to vector<1x8x8xf32>
    %65 = vector.broadcast %64 : vector<1x8x8xf32> to vector<4x8x8xf32>
    %66 = arith.addf %62, %65 : vector<4x8x8xf32>
    %cst_18 = arith.constant dense<0xFF800000> : vector<4x8xf32>
    %67 = vector.multi_reduction <maximumf>, %66, %cst_18 [2] : vector<4x8x8xf32> to vector<4x8xf32>
    %68 = vector.shape_cast %67 : vector<4x8xf32> to vector<4x8x1xf32>
    %69 = vector.broadcast %68 : vector<4x8x1xf32> to vector<4x8x8xf32>
    %70 = arith.subf %66, %69 : vector<4x8x8xf32>
    %71 = math.exp %70 : vector<4x8x8xf32>
    %cst_19 = arith.constant dense<0.000000e+00> : vector<4x8xf32>
    %72 = vector.multi_reduction <add>, %71, %cst_19 [2] : vector<4x8x8xf32> to vector<4x8xf32>
    %73 = vector.shape_cast %72 : vector<4x8xf32> to vector<4x8x1xf32>
    %74 = tpu.reciprocal %73 {approx = true} : vector<4x8x1xf32> -> vector<4x8x1xf32>
    %75 = vector.broadcast %74 : vector<4x8x1xf32> to vector<4x8x8xf32>
    %76 = arith.mulf %71, %75 : vector<4x8x8xf32>
    %77 = arith.truncf %76 : vector<4x8x8xf32> to vector<4x8x8xbf16>
    "tpu.trace_start"() <{level = 10 : i32, message = "hqk,hkd->hqd"}> : () -> ()
    %cst_20 = arith.constant dense<0.000000e+00> : vector<4x8x8xf32>
    %78 = tpu.matmul %77, %61, %cst_20 {dimension_numbers = #tpu.dot_dimension_numbers<[2], [1], [1], [2], [0, 0, 0, 1, 1, 2], [0], [0]>} : vector<4x8x8xbf16>, vector<4x8x8xbf16>, vector<4x8x8xf32> -> vector<4x8x8xf32>
    "tpu.trace_stop"() : () -> ()
    %79 = vector.extract_strided_slice %78 {offsets = [0, 0, 0], sizes = [1, 8, 8], strides = [1, 1, 1]} : vector<4x8x8xf32> to vector<1x8x8xf32>
    %80 = vector.shape_cast %79 : vector<1x8x8xf32> to vector<8x8xf32>
    %81 = vector.extract_strided_slice %78 {offsets = [1, 0, 0], sizes = [1, 8, 8], strides = [1, 1, 1]} : vector<4x8x8xf32> to vector<1x8x8xf32>
    %82 = vector.shape_cast %81 : vector<1x8x8xf32> to vector<8x8xf32>
    %83 = vector.extract_strided_slice %78 {offsets = [2, 0, 0], sizes = [1, 8, 8], strides = [1, 1, 1]} : vector<4x8x8xf32> to vector<1x8x8xf32>
    %84 = vector.shape_cast %83 : vector<1x8x8xf32> to vector<8x8xf32>
    %85 = vector.extract_strided_slice %78 {offsets = [3, 0, 0], sizes = [1, 8, 8], strides = [1, 1, 1]} : vector<4x8x8xf32> to vector<1x8x8xf32>
    %86 = vector.shape_cast %85 : vector<1x8x8xf32> to vector<8x8xf32>
    %87 = tpu.concatenate %80, %82, %84, %86 in 1 : vector<8x8xf32>, vector<8x8xf32>, vector<8x8xf32>, vector<8x8xf32> -> vector<8x32xf32>
    %88 = arith.truncf %87 : vector<8x32xf32> to vector<8x32xbf16>
    %c0_21 = arith.constant 0 : index
    %c0_22 = arith.constant 0 : index
    %89 = vector.load %arg7[%c0_21, %c0_22] : memref<32x32xbf16, #tpu.memory_space<vmem>>, vector<32x32xbf16>
    %cst_23 = arith.constant dense<0.000000e+00> : vector<8x32xf32>
    %90 = tpu.matmul %88, %89, %cst_23 {dimension_numbers = #tpu.dot_dimension_numbers<[1], [0], [0], [1], [0, 0, 1, 1], [], []>} : vector<8x32xbf16>, vector<32x32xbf16>, vector<8x32xf32> -> vector<8x32xf32>
    %c0_24 = arith.constant 0 : index
    %c0_25 = arith.constant 0 : index
    %91 = vector.load %arg8[%c0_24, %c0_25] : memref<1x32xf32, #tpu.memory_space<vmem>>, vector<1x32xf32>
    %92 = vector.broadcast %91 : vector<1x32xf32> to vector<8x32xf32>
    %93 = arith.addf %90, %92 : vector<8x32xf32>
    %94 = arith.addf %1, %93 : vector<8x32xf32>
    %c0_26 = arith.constant 0 : index
    %c0_27 = arith.constant 0 : index
    %95 = vector.load %arg9[%c0_26, %c0_27] : memref<1x32xf32, #tpu.memory_space<vmem>>, vector<1x32xf32>
    %c0_28 = arith.constant 0 : index
    %c0_29 = arith.constant 0 : index
    %96 = vector.load %arg10[%c0_28, %c0_29] : memref<1x32xf32, #tpu.memory_space<vmem>>, vector<1x32xf32>
    %cst_30 = arith.constant dense<0.000000e+00> : vector<8xf32>
    %97 = vector.multi_reduction <add>, %94, %cst_30 [1] : vector<8x32xf32> to vector<8xf32>
    %98 = vector.shape_cast %97 : vector<8xf32> to vector<8x1xf32>
    %cst_31 = arith.constant 3.200000e+01 : f32
    %99 = vector.broadcast %cst_31 : f32 to vector<8x1xf32>
    %100 = arith.divf %98, %99 : vector<8x1xf32>
    %101 = vector.broadcast %100 : vector<8x1xf32> to vector<8x32xf32>
    %102 = arith.subf %94, %101 : vector<8x32xf32>
    %103 = arith.mulf %102, %102 : vector<8x32xf32>
    %cst_32 = arith.constant dense<0.000000e+00> : vector<8xf32>
    %104 = vector.multi_reduction <add>, %103, %cst_32 [1] : vector<8x32xf32> to vector<8xf32>
    %105 = vector.shape_cast %104 : vector<8xf32> to vector<8x1xf32>
    %cst_33 = arith.constant 3.200000e+01 : f32
    %106 = vector.broadcast %cst_33 : f32 to vector<8x1xf32>
    %107 = arith.divf %105, %106 : vector<8x1xf32>
    %108 = vector.broadcast %100 : vector<8x1xf32> to vector<8x32xf32>
    %109 = arith.subf %94, %108 : vector<8x32xf32>
    %cst_34 = arith.constant 9.99999974E-6 : f32
    %110 = vector.broadcast %cst_34 : f32 to vector<8x1xf32>
    %111 = arith.addf %107, %110 : vector<8x1xf32>
    %112 = math.rsqrt %111 : vector<8x1xf32>
    %113 = vector.broadcast %112 : vector<8x1xf32> to vector<8x32xf32>
    %114 = arith.mulf %109, %113 : vector<8x32xf32>
    %115 = vector.broadcast %95 : vector<1x32xf32> to vector<8x32xf32>
    %116 = arith.mulf %114, %115 : vector<8x32xf32>
    %117 = vector.broadcast %96 : vector<1x32xf32> to vector<8x32xf32>
    %118 = arith.addf %116, %117 : vector<8x32xf32>
    %119 = arith.truncf %118 : vector<8x32xf32> to vector<8x32xbf16>
    %c0_35 = arith.constant 0 : index
    %c0_36 = arith.constant 0 : index
    %120 = vector.load %arg11[%c0_35, %c0_36] : memref<32x128xbf16, #tpu.memory_space<vmem>>, vector<32x128xbf16>
    %cst_37 = arith.constant dense<0.000000e+00> : vector<8x128xf32>
    %121 = tpu.matmul %119, %120, %cst_37 {dimension_numbers = #tpu.dot_dimension_numbers<[1], [0], [0], [1], [0, 0, 1, 1], [], []>} : vector<8x32xbf16>, vector<32x128xbf16>, vector<8x128xf32> -> vector<8x128xf32>
    %c0_38 = arith.constant 0 : index
    %c0_39 = arith.constant 0 : index
    %122 = vector.load %arg12[%c0_38, %c0_39] : memref<1x128xf32, #tpu.memory_space<vmem>>, vector<1x128xf32>
    %123 = vector.broadcast %122 : vector<1x128xf32> to vector<8x128xf32>
    %124 = arith.addf %121, %123 : vector<8x128xf32>
    %cst_40 = arith.constant 1.702000e+00 : f32
    %125 = vector.broadcast %cst_40 : f32 to vector<8x128xf32>
    %126 = arith.mulf %125, %124 : vector<8x128xf32>
    %127 = arith.negf %126 : vector<8x128xf32>
    %128 = math.exp %127 : vector<8x128xf32>
    %cst_41 = arith.constant 1.000000e+00 : f32
    %129 = vector.broadcast %cst_41 : f32 to vector<8x128xf32>
    %130 = arith.addf %129, %128 : vector<8x128xf32>
    %131 = arith.divf %129, %130 : vector<8x128xf32>
    %132 = arith.mulf %124, %131 : vector<8x128xf32>
    %133 = arith.truncf %132 : vector<8x128xf32> to vector<8x128xbf16>
    %c0_42 = arith.constant 0 : index
    %c0_43 = arith.constant 0 : index
    %134 = vector.load %arg13[%c0_42, %c0_43] : memref<128x32xbf16, #tpu.memory_space<vmem>>, vector<128x32xbf16>
    %cst_44 = arith.constant dense<0.000000e+00> : vector<8x32xf32>
    %135 = tpu.matmul %133, %134, %cst_44 {dimension_numbers = #tpu.dot_dimension_numbers<[1], [0], [0], [1], [0, 0, 1, 1], [], []>} : vector<8x128xbf16>, vector<128x32xbf16>, vector<8x32xf32> -> vector<8x32xf32>
    %c0_45 = arith.constant 0 : index
    %c0_46 = arith.constant 0 : index
    %136 = vector.load %arg14[%c0_45, %c0_46] : memref<1x32xf32, #tpu.memory_space<vmem>>, vector<1x32xf32>
    %137 = vector.broadcast %136 : vector<1x32xf32> to vector<8x32xf32>
    %138 = arith.addf %135, %137 : vector<8x32xf32>
    %139 = arith.addf %94, %138 : vector<8x32xf32>
    %c0_47 = arith.constant 0 : index
    %c0_48 = arith.constant 0 : index
    %140 = vector.load %arg15[%c0_47, %c0_48] : memref<1x32xf32, #tpu.memory_space<vmem>>, vector<1x32xf32>
    %c0_49 = arith.constant 0 : index
    %c0_50 = arith.constant 0 : index
    %141 = vector.load %arg16[%c0_49, %c0_50] : memref<1x32xf32, #tpu.memory_space<vmem>>, vector<1x32xf32>
    %cst_51 = arith.constant dense<0.000000e+00> : vector<8xf32>
    %142 = vector.multi_reduction <add>, %139, %cst_51 [1] : vector<8x32xf32> to vector<8xf32>
    %143 = vector.shape_cast %142 : vector<8xf32> to vector<8x1xf32>
    %cst_52 = arith.constant 3.200000e+01 : f32
    %144 = vector.broadcast %cst_52 : f32 to vector<8x1xf32>
    %145 = arith.divf %143, %144 : vector<8x1xf32>
    %146 = vector.broadcast %145 : vector<8x1xf32> to vector<8x32xf32>
    %147 = arith.subf %139, %146 : vector<8x32xf32>
    %148 = arith.mulf %147, %147 : vector<8x32xf32>
    %cst_53 = arith.constant dense<0.000000e+00> : vector<8xf32>
    %149 = vector.multi_reduction <add>, %148, %cst_53 [1] : vector<8x32xf32> to vector<8xf32>
    %150 = vector.shape_cast %149 : vector<8xf32> to vector<8x1xf32>
    %cst_54 = arith.constant 3.200000e+01 : f32
    %151 = vector.broadcast %cst_54 : f32 to vector<8x1xf32>
    %152 = arith.divf %150, %151 : vector<8x1xf32>
    %153 = vector.broadcast %145 : vector<8x1xf32> to vector<8x32xf32>
    %154 = arith.subf %139, %153 : vector<8x32xf32>
    %cst_55 = arith.constant 9.99999974E-6 : f32
    %155 = vector.broadcast %cst_55 : f32 to vector<8x1xf32>
    %156 = arith.addf %152, %155 : vector<8x1xf32>
    %157 = math.rsqrt %156 : vector<8x1xf32>
    %158 = vector.broadcast %157 : vector<8x1xf32> to vector<8x32xf32>
    %159 = arith.mulf %154, %158 : vector<8x32xf32>
    %160 = vector.broadcast %140 : vector<1x32xf32> to vector<8x32xf32>
    %161 = arith.mulf %159, %160 : vector<8x32xf32>
    %162 = vector.broadcast %141 : vector<1x32xf32> to vector<8x32xf32>
    %163 = arith.addf %161, %162 : vector<8x32xf32>
    %c0_56 = arith.constant 0 : index
    %c0_57 = arith.constant 0 : index
    %c0_58 = arith.constant 0 : index
    %164 = vector.load %arg17[%c0_56, %c0_57, %c0_58] : memref<1x8x32xf32, #tpu.memory_space<vmem>>, vector<1x8x32xf32>
    %165 = vector.shape_cast %164 : vector<1x8x32xf32> to vector<8x32xf32>
    %166 = vector.shape_cast %163 : vector<8x32xf32> to vector<1x8x32xf32>
    tpu.vector_store %arg17[%c0_56, %c0_57, %c0_58], %166 {strides = array<i32>} : memref<1x8x32xf32, #tpu.memory_space<vmem>>, vector<1x8x32xf32>,
    return
  }
  func.func @transform_0(%arg0: i32) -> (i32, i32, i32) {
    %c0_i32 = arith.constant 0 : i32
    %c0_i32_0 = arith.constant 0 : i32
    %c0_i32_1 = arith.constant 0 : i32
    return %arg0, %c0_i32, %c0_i32_0 : i32, i32, i32
  }
  func.func @transform_1(%arg0: i32) -> (i32, i32) {
    %c0_i32 = arith.constant 0 : i32
    %c0_i32_0 = arith.constant 0 : i32
    %c0_i32_1 = arith.constant 0 : i32
    return %c0_i32, %c0_i32_0 : i32, i32
  }
  func.func @transform_2(%arg0: i32) -> (i32, i32) {
    %c0_i32 = arith.constant 0 : i32
    %c0_i32_0 = arith.constant 0 : i32
    %c0_i32_1 = arith.constant 0 : i32
    return %c0_i32, %c0_i32_0 : i32, i32
  }
  func.func @transform_3(%arg0: i32) -> (i32, i32) {
    %c0_i32 = arith.constant 0 : i32
    %c0_i32_0 = arith.constant 0 : i32
    %c0_i32_1 = arith.constant 0 : i32
    return %c0_i32, %c0_i32_0 : i32, i32
  }
  func.func @transform_4(%arg0: i32) -> (i32, i32) {
    %c0_i32 = arith.constant 0 : i32
    %c0_i32_0 = arith.constant 0 : i32
    %c0_i32_1 = arith.constant 0 : i32
    return %c0_i32, %c0_i32_0 : i32, i32
  }
  func.func @transform_5(%arg0: i32) -> (i32, i32) {
    %c0_i32 = arith.constant 0 : i32
    %c0_i32_0 = arith.constant 0 : i32
    %c0_i32_1 = arith.constant 0 : i32
    return %c0_i32, %c0_i32_0 : i32, i32
  }
  func.func @transform_6(%arg0: i32) -> (i32, i32) {
    %c0_i32 = arith.constant 0 : i32
    %c0_i32_0 = arith.constant 0 : i32
    %c0_i32_1 = arith.constant 0 : i32
    return %c0_i32, %c0_i32_0 : i32, i32
  }
  func.func @transform_7(%arg0: i32) -> (i32, i32) {
    %c0_i32 = arith.constant 0 : i32
    %c0_i32_0 = arith.constant 0 : i32
    %c0_i32_1 = arith.constant 0 : i32
    return %c0_i32, %c0_i32_0 : i32, i32
  }
  func.func @transform_8(%arg0: i32) -> (i32, i32) {
    %c0_i32 = arith.constant 0 : i32
    %c0_i32_0 = arith.constant 0 : i32
    %c0_i32_1 = arith.constant 0 : i32
    return %c0_i32, %c0_i32_0 : i32, i32
  }
  func.func @transform_9(%arg0: i32) -> (i32, i32) {
    %c0_i32 = arith.constant 0 : i32
    %c0_i32_0 = arith.constant 0 : i32
    %c0_i32_1 = arith.constant 0 : i32
    return %c0_i32, %c0_i32_0 : i32, i32
  }
  func.func @transform_10(%arg0: i32) -> (i32, i32) {
    %c0_i32 = arith.constant 0 : i32
    %c0_i32_0 = arith.constant 0 : i32
    %c0_i32_1 = arith.constant 0 : i32
    return %c0_i32, %c0_i32_0 : i32, i32
  }
  func.func @transform_11(%arg0: i32) -> (i32, i32) {
    %c0_i32 = arith.constant 0 : i32
    %c0_i32_0 = arith.constant 0 : i32
    %c0_i32_1 = arith.constant 0 : i32
    return %c0_i32, %c0_i32_0 : i32, i32
  }
  func.func @transform_12(%arg0: i32) -> (i32, i32) {
    %c0_i32 = arith.constant 0 : i32
    %c0_i32_0 = arith.constant 0 : i32
    %c0_i32_1 = arith.constant 0 : i32
    return %c0_i32, %c0_i32_0 : i32, i32
  }
  func.func @transform_13(%arg0: i32) -> (i32, i32) {
    %c0_i32 = arith.constant 0 : i32
    %c0_i32_0 = arith.constant 0 : i32
    %c0_i32_1 = arith.constant 0 : i32
    return %c0_i32, %c0_i32_0 : i32, i32
  }
  func.func @transform_14(%arg0: i32) -> (i32, i32) {
    %c0_i32 = arith.constant 0 : i32
    %c0_i32_0 = arith.constant 0 : i32
    %c0_i32_1 = arith.constant 0 : i32
    return %c0_i32, %c0_i32_0 : i32, i32
  }
  func.func @transform_15(%arg0: i32) -> (i32, i32) {
    %c0_i32 = arith.constant 0 : i32
    %c0_i32_0 = arith.constant 0 : i32
    %c0_i32_1 = arith.constant 0 : i32
    return %c0_i32, %c0_i32_0 : i32, i32
  }
  func.func @transform_16(%arg0: i32) -> (i32, i32, i32) {
    %c0_i32 = arith.constant 0 : i32
    %c0_i32_0 = arith.constant 0 : i32
    %c0_i32_1 = arith.constant 0 : i32
    return %arg0, %c0_i32, %c0_i32_0 : i32, i32, i32
  }
}

</mosaic_0001>

<bundles_post_ra>
// kernel: sd_clip_forward.3
= control target key start
LH: loop header
LB: loop body
LE: loop exit
PB: predicated region body
PF: predicated region fallthrough
CT: control target
= control target key end

     0   :  { %s1787_s21 = smov 0   ;;  %s2001_s0 = inlined_call_operand.vmem [shape: f32[2,8,32], index: 0, kind: input, shape index: {}, may-alias: {0,16}]   ;;  %s2002_s1 = inlined_call_operand.vmem [shape: f32[8,8], index: 1, kind: input, shape index: {}]   ;;  %s2003_s2 = inlined_call_operand.vmem [shape: f32[1,32], index: 2, kind: input, shape index: {}]   ;;  %s2004_s3 = inlined_call_operand.vmem [shape: f32[1,32], index: 3, kind: input, shape index: {}]   ;;  %s2005_s4 = inlined_call_operand.vmem [shape: bf16[32,96], index: 4, kind: input, shape index: {}]   ;;  %s2006_s5 = inlined_call_operand.vmem [shape: f32[1,96], index: 5, kind: input, shape index: {}]   ;;  %s2007_s6 = inlined_call_operand.vmem [shape: bf16[32,32], index: 6, kind: input, shape index: {}]   ;;  %s2008_s7 = inlined_call_operand.vmem [shape: f32[1,32], index: 7, kind: input, shape index: {}]   ;;  %s2009_s8 = inlined_call_operand.vmem [shape: f32[1,32], index: 8, kind: input, shape index: {}]   ;;  %s2010_s9 = inlined_call_operand.vmem [shape: f32[1,32], index: 9, kind: input, shape index: {}]   ;;  %s2011_s10 = inlined_call_operand.vmem [shape: bf16[32,128], index: 10, kind: input, shape index: {}]   ;;  %s2012_s11 = inlined_call_operand.vmem [shape: f32[1,128], index: 11, kind: input, shape index: {}]   ;;  %s2013_s12 = inlined_call_operand.vmem [shape: bf16[128,32], index: 12, kind: input, shape index: {}]   ;;  %s2014_s13 = inlined_call_operand.vmem [shape: f32[1,32], index: 13, kind: input, shape index: {}]   ;;  %s2015_s14 = inlined_call_operand.vmem [shape: f32[1,32], index: 14, kind: input, shape index: {}]   ;;  %s2016_s15 = inlined_call_operand.vmem [shape: f32[1,32], index: 15, kind: input, shape index: {}]   ;;  %s2017_s16 = inlined_call_operand.vmem [shape: f32[2,8,32], index: 16, kind: output, shape index: {}, may-alias: {0,16}]  }
   0x1   :  { %2018 = sst [smem:[#allocation2_spill]] %s2001_s0 }
   0x2 LB: > { %s1455_s22 = sadd.s32 4294967295, %s1690_s21   ;;  %p1459_p0 = scmp.ge.s32.totalorder %s1690_s21, 1  ;;  %s1690_s21 = sphi %s1787_s21, %s26_s21  }
   0x3   : > { %p461_p1 = scmp.lt.s32.totalorder %s1690_s21, 3 }
   0x5   : > { %p462_p2 = pnand %p1459_p0, %p461_p1 }
   0x6   : > { %p509_p3 = scmp.lt.s32.totalorder (!%p462_p2), %s1455_s22, 1  ;;  %vm521_vm0 = vcmask (!%p462_p2), 261120   ;;  %s2019_s26 = sld [smem:[#allocation2_spill]] (!%p462_p2)  ;;  %v1644_v7 = vld [vmem:[%s2005_s4] sm:$0xff] (!%p462_p2)   ;;  %v1692_v8 = vmov (!%p462_p2), 0.0   ;;  %vm1693_vm1 = vmmov (!%p462_p2), 0  }
   0x7   : > { %465 = sbr.rel (%p462_p2) target bundleno = 2963 (0xb93), region = 84  ;;  %1534 = vmatprep.subr.bf16.mxu0 (!%p462_p2), %v1692_v8  ;;  %1538 = vmatprep.mubr.msk.bf16.mxu0 (!%p462_p2), %vm1693_vm1, %v1692_v8  ;;  %v1645_v9 = vld [vmem:[%s2005_s4 + $0x8] sm:$0xff] (!%p462_p2)   ;;  %v1462_v14 = vld [vmem:[%s2003_s2] ss:$0 sm:$0xff] (!%p462_p2)  ;;  %s1696_s28 = smov (!%p462_p2), 112   ;;  %vm635_vm2 = vcmask (!%p462_p2), 64512  }
   0x8   : > { %1535 = vmatpush3.bf16.msra.mxu0 (!%p462_p2), %v1644_v7  ;;  %1554 = vmatprep.subr.bf16.mxu1 (!%p462_p2), %v1692_v8  ;;  %v1463_v16 = vld [vmem:[%s2004_s3] ss:$0 sm:$0xff] (!%p462_p2)  ;;  %s1697_s29 = smov (!%p462_p2), 96   ;;  %s1698_s17 = smov (!%p462_p2), 64   ;;  %vm882_vm3 = vcmask (!%p462_p2), 1043456   ;;  %vm1083_vm4 = vcmask (!%p462_p2), 130048  }
   0x9   : > { %1536 = vmatprep.subr.bf16.mxu0 (!%p462_p2), %v1692_v8  ;;  %1556 = vmatprep.mubr.msk.bf16.mxu1 (!%p462_p2), %vm1693_vm1, %v1692_v8  ;;  %v1464_v20 = vld [vmem:[%s2006_s5] ss:$0 sm:$0xff] (!%p462_p2)  ;;  %s1699_s25 = smov (!%p462_p2), 8   ;;  %vm1085_vm5 = vcmask (!%p462_p2), 195584  }
   0xa   : > { %v631_v41 = vld [vmem:[%s2002_s1] sm:$0xff] (!%p462_p2) }
   0xc   : > { %1537 = vmatpush3.bf16.msra.mxu0 (!%p462_p2), %v1645_v9 }
   0xd   : > { %1542 = vmatprep.subr.bf16.mxu0 (!%p462_p2), %v1692_v8 }
   0xe   : > { %s2021_s22 = smov (!%p509_p3, %s1455_s22), 1 }
   0xf   : > { %s1460_s23 = sshll.u32 %s2021_s22, 3 }
  0x10   : > { %s512_s27 = scalar_lea.vmem %s2019_s26, %s1460_s23  ;;  %s1694_s26 = smov 104  }
  0x11   : > { %v1803_v0 = vld [vmem:[%s512_s27] sm:$0xff]  ;;  %s1695_s27 = smov 120  }
  0x12   : > { %v522_v1 = vsel %vm521_vm0, %v1803_v0, 0.0 }
  0x13   : > { %523 = vadd.xlane.f32.xlu0 %v522_v1 }
  0xa0   : > { %v524_v2 = vpop.xlane.xlu0 %523 }
  0xa1   : > { %v526_v3 = vmul.f32 0.03125, %v524_v2 }
  0xa3   : > { %v527_v4 = vsub.f32 %v1803_v0, %v526_v3 }
  0xa5   : > { %v528_v5 = vmul.f32 %v527_v4, %v527_v4 }
  0xa7   : > { %v529_v6 = vsel %vm521_vm0, %v528_v5, 0.0 }
  0xa8   : > { %530 = vadd.xlane.f32.xlu0 %v529_v6 }
 0x135   : > { %v531_v10 = vpop.xlane.xlu0 %530 }
 0x136   : > { %v532_v11 = vmul.f32 0.03125, %v531_v10 }
 0x138   : > { %v533_v12 = vadd.f32 1e-05, %v532_v11 }
 0x13a   : > { %1658 = vrsqrt.f32 %v533_v12 }
 0x144   : > { %v1659_v13 = vpop.eup %1658 }
 0x145   : > { %v535_v15 = vmul.f32 %v1659_v13, %v527_v4 }
 0x147   : > { %v542_v17 = vmul.f32 %v1462_v14, %v535_v15 }
 0x149   : > { %v549_v18 = vadd.f32 %v1463_v16, %v542_v17 }
 0x14b   : > { %v550_v19 = vpack.c.bf16 %v549_v18, %v549_v18 }
 0x14d   : > { %1539 = vmatmul.mubr.msk.bf16.vlgmr.msra.gmra.mrb[0].mxu0 %vm521_vm0, %v550_v19 }
 0x14e   : > { %1544 = vmatprep.mubr.msk.bf16.mxu0 %vm1693_vm1, %v1692_v8 }
 0x220   : > { %v611_v21 = vpop.f32.mrb[0].mxu0 }
 0x221   : > { %v612_v22 = vadd.f32 %v1464_v20, %v611_v21  ;;  %v1540_v23 = vpop.f32.mrb[1].mxu0 }
 0x222   : > { %v614_v24 = vpop.f32.mrb[2].mxu0 }
 0x223   : > { %624 = vrot.lane.b32.xlu0 %v612_v22, %s1694_s26  ;;  %618 = vrot.lane.b32.xlu1 %v612_v22, %s1695_s27  ;;  %v1541_v25 = vpop.f32.mrb[3].mxu0  ;;  %v1835_v26 = vpack.c.bf16 %v612_v22, %v612_v22  ;;  %s1700_s26 = smov 16   ;;  %s1701_s27 = smov 24  }
 0x227   : > { %621 = vrot.lane.b32.xlu1 %v612_v22, %s1696_s28  ;;  %s516_s28 = scalar_lea.vmem %s2017_s16, %s1460_s23 }
 0x22b   : > { %633 = vrot.lane.b32.xlu1 %v1835_v26, %s1697_s29 }
 0x295   : > { %v619_v27 = vpop.permute.xlu1 %618  ;;  %v625_v31 = vpop.permute.xlu0 %624 }
 0x296   : > { %v1838_v28 = vpack.c.bf16 %v619_v27, %v619_v27  ;;  %v1844_v33 = vpack.c.bf16 %v625_v31, %v625_v31 }
 0x298   : > { %683 = vrot.lane.b32.xlu1 %v1838_v28, %s1697_s29 }
 0x299   : > { %v622_v29 = vpop.permute.xlu1 %621 }
 0x29a   : > { %v1841_v30 = vpack.c.bf16 %v622_v29, %v622_v29 }
 0x29c   : > { %732 = vrot.lane.b32.xlu1 %v1841_v30, %s1697_s29 }
 0x29d   : > { %v634_v32 = vpop.permute.xlu1 %633 }
 0x29e   : > { %v640_v34 = vsel %vm635_vm2, %v634_v32, 0 }
 0x29f   : > { %1543 = vmatpush3.bf16.xpose.msra.mxu0 %v640_v34 }
 0x2a0   : > { %781 = vrot.lane.b32.xlu1 %v1844_v33, %s1697_s29  ;;  %1548 = vmatprep.subr.bf16.mxu0 %v1692_v8 }
 0x2a6   : > { %1545 = vmatmul.mubr.msk.bf16.vlgmr.msra.gmra.mrb[4].mxu0 %vm635_vm2, %v1835_v26 }
 0x2a7   : > { %1550 = vmatprep.mubr.msk.bf16.mxu0 %vm1693_vm1, %v1692_v8 }
 0x30a   : > { %v684_v35 = vpop.permute.xlu1 %683 }
 0x30b   : > { %v689_v36 = vsel %vm635_vm2, %v684_v35, 0 }
 0x30c   : > { %1549 = vmatpush3.bf16.xpose.msra.mxu0 %v689_v36 }
 0x30d   : > { %1560 = vmatprep.subr.bf16.mxu0 %v1692_v8 }
 0x30e   : > { %v733_v37 = vpop.permute.xlu1 %732 }
 0x30f   : > { %v738_v38 = vsel %vm635_vm2, %v733_v37, 0 }
 0x310   : > { %1555 = vmatpush3.bf16.xpose.msra.mxu1 %v738_v38 }
 0x311   : > { %1566 = vmatprep.subr.bf16.mxu1 %v1692_v8 }
 0x312   : > { %v782_v39 = vpop.permute.xlu1 %781 }
 0x313   : > { %v787_v40 = vsel %vm635_vm2, %v782_v39, 0  ;;  %1551 = vmatmul.mubr.msk.bf16.vlgmr.msra.gmra.mrb[8].mxu0 %vm635_vm2, %v1838_v28 }
 0x314   : > { %1561 = vmatpush3.bf16.xpose.msra.mxu0 %v787_v40  ;;  %1562 = vmatprep.mubr.msk.bf16.mxu0 %vm1693_vm1, %v1692_v8 }
 0x315   : > { %1572 = vmatprep.subr.bf16.mxu0 %v1692_v8 }
 0x317   : > { %1557 = vmatmul.mubr.msk.bf16.vlgmr.msra.gmra.mrb[0].mxu1 %vm635_vm2, %v1841_v30 }
 0x318   : > { %1568 = vmatprep.mubr.msk.bf16.mxu1 %vm1693_vm1, %v1692_v8 }
 0x31b   : > { %1563 = vmatmul.mubr.msk.bf16.vlgmr.msra.gmra.mrb[12].mxu0 %vm635_vm2, %v1844_v33 }
 0x31c   : > { %1574 = vmatprep.mubr.msk.bf16.mxu0 %vm1693_vm1, %v1692_v8 }
 0x379   : > { %v676_v42 = vpop.f32.mrb[4].mxu0 }
 0x37a   : > { %v677_v43 = vadd.f32 %v676_v42, %v631_v41  ;;  %v1546_v44 = vpop.f32.mrb[5].mxu0 }
 0x37b   : > { %v679_v45 = vpop.f32.mrb[6].mxu0 }
 0x37c   : > { %v1547_v46 = vpop.f32.mrb[7].mxu0  ;;  %v829_v47 = vsel %vm635_vm2, %v677_v43, -inf }
 0x37d   : > { %830 = vmax.xlane.f32.xlu1 %v829_v47 }
 0x3e6   : > { %v725_v48 = vpop.f32.mrb[8].mxu0 }
 0x3e7   : > { %v726_v49 = vadd.f32 %v725_v48, %v631_v41  ;;  %v1552_v50 = vpop.f32.mrb[9].mxu0 }
 0x3e8   : > { %v728_v51 = vpop.f32.mrb[10].mxu0 }
 0x3e9   : > { %v1553_v52 = vpop.f32.mrb[11].mxu0  ;;  %v832_v53 = vsel %vm635_vm2, %v726_v49, -inf }
 0x3ea   : > { %v774_v54 = vpop.f32.mrb[0].mxu1  ;;  %833 = vmax.xlane.f32.xlu0 %v832_v53  ;;  %v1646_v52 = vld [vmem:[%s2007_s6] sm:$0xff]   ;;  %v1647_v53 = vld [vmem:[%s2007_s6 + $0x8] sm:$0xff]  }
 0x3eb   : > { %v775_v55 = vadd.f32 %v774_v54, %v631_v41  ;;  %v1558_v56 = vpop.f32.mrb[1].mxu1 }
 0x3ec   : > { %v777_v57 = vpop.f32.mrb[2].mxu1 }
 0x3ed   : > { %v1559_v58 = vpop.f32.mrb[3].mxu1  ;;  %v835_v59 = vsel %vm635_vm2, %v775_v55, -inf }
 0x3ee   : > { %836 = vmax.xlane.f32.xlu1 %v835_v59  ;;  %v823_v60 = vpop.f32.mrb[12].mxu0 }
 0x3ef   : > { %v824_v61 = vadd.f32 %v823_v60, %v631_v41  ;;  %v1564_v62 = vpop.f32.mrb[13].mxu0 }
 0x3f0   : > { %v826_v63 = vpop.f32.mrb[14].mxu0 }
 0x3f1   : > { %v1565_v1 = vpop.f32.mrb[15].mxu0  ;;  %v838_v2 = vsel %vm635_vm2, %v824_v61, -inf }
 0x3f2   : > { %839 = vmax.xlane.f32.xlu0 %v838_v2 }
 0x3ff   : > { %877 = vrot.lane.b32.xlu1 %v1835_v26, %s1698_s17 }
 0x40a   : > { %v831_v3 = vpop.xlane.xlu1 %830 }
 0x40b   : > { %v841_v4 = vsub.f32 %v677_v43, %v831_v3 }
 0x40d   : > { %v845_v5 = vmul.f32 1.442695, %v841_v4 }
 0x40f   : > { %1660 = vpow2.f32 %v845_v5 }
 0x419   : > { %v1661_v6 = vpop.eup %1660 }
 0x41a   : > { %v853_v7 = vsel %vm635_vm2, %v1661_v6, 0.0 }
 0x423   : > { %854 = vadd.xlane.f32.xlu1 %v853_v7 }
 0x477   : > { %v834_v9 = vpop.xlane.xlu0 %833 }
 0x478   : > { %v842_v10 = vsub.f32 %v726_v49, %v834_v9 }
 0x47a   : > { %v847_v11 = vmul.f32 1.442695, %v842_v10 }
 0x47b   : > { %v837_v12 = vpop.xlane.xlu1 %836 }
 0x47c   : > { %1662 = vpow2.f32 %v847_v11  ;;  %v843_v13 = vsub.f32 %v775_v55, %v837_v12  ;;  %v1476_v11 = vld [vmem:[%s2008_s7] ss:$0 sm:$0xff] }
 0x47e   : > { %v849_v14 = vmul.f32 1.442695, %v843_v13 }
 0x47f   : > { %v878_v15 = vpop.permute.xlu1 %877  ;;  %v840_v16 = vpop.xlane.xlu0 %839 }
 0x480   : > { %1664 = vpow2.f32 %v849_v14  ;;  %v884_v17 = vsel %vm882_vm3, %v878_v15, 0  ;;  %v844_v18 = vsub.f32 %v824_v61, %v840_v16 }
 0x481   : > { %1567 = vmatpush3.bf16.msra.mxu1 %v884_v17 }
 0x482   : > { %v851_v19 = vmul.f32 1.442695, %v844_v18  ;;  %1578 = vmatprep.subr.bf16.mxu1 %v1692_v8 }
 0x484   : > { %1666 = vpow2.f32 %v851_v19 }
 0x486   : > { %v1663_v20 = vpop.eup %1662 }
 0x487   : > { %v856_v21 = vsel %vm635_vm2, %v1663_v20, 0.0 }
 0x488   : > { %857 = vadd.xlane.f32.xlu0 %v856_v21 }
 0x48a   : > { %v1665_v22 = vpop.eup %1664 }
 0x48b   : > { %v859_v23 = vsel %vm635_vm2, %v1665_v22, 0.0 }
 0x48c   : > { %860 = vadd.xlane.f32.xlu1 %v859_v23 }
 0x48e   : > { %v1667_v24 = vpop.eup %1666 }
 0x48f   : > { %v862_v25 = vsel %vm635_vm2, %v1667_v24, 0.0 }
 0x490   : > { %863 = vadd.xlane.f32.xlu0 %v862_v25 }
 0x49d   : > { %974 = vrot.lane.b32.xlu1 %v1841_v30, %s1698_s17 }
 0x4a1   : > { %1022 = vrot.lane.b32.xlu1 %v1844_v33, %s1698_s17 }
 0x4a6   : > { %926 = vrot.lane.b32.xlu0 %v1838_v28, %s1698_s17 }
 0x4b0   : > { %v855_v26 = vpop.xlane.xlu1 %854 }
 0x4b1   : > { %1668 = vrcp.f32 %v855_v26 }
 0x4bb   : > { %v1669_v27 = vpop.eup %1668 }
 0x4bc   : > { %v869_v29 = vmul.f32 %v1669_v27, %v1661_v6 }
 0x4be   : > { %v873_v31 = vpack.c.bf16 %v869_v29, %v869_v29 }
 0x4c0   : > { %1569 = vmatmul.mubr.msk.bf16.vlgmr.msra.gmra.mrb[4].mxu1 %vm635_vm2, %v873_v31  ;;  %v1480_v31 = vld [vmem:[%s2009_s8] ss:$0 sm:$0xff] }
 0x4c1   : > { %1580 = vmatprep.mubr.msk.bf16.mxu1 %vm1693_vm1, %v1692_v8 }
 0x515   : > { %v858_v32 = vpop.xlane.xlu0 %857 }
 0x516   : > { %1670 = vrcp.f32 %v858_v32 }
 0x519   : > { %v861_v34 = vpop.xlane.xlu1 %860 }
 0x51a   : > { %1672 = vrcp.f32 %v861_v34  ;;  %v1481_v34 = vld [vmem:[%s2010_s9] ss:$0 sm:$0xff] }
 0x51d   : > { %v975_v30 = vpop.permute.xlu1 %974  ;;  %v864_v35 = vpop.xlane.xlu0 %863 }
 0x51e   : > { %v980_v33 = vsel %vm882_vm3, %v975_v30, 0  ;;  %1674 = vrcp.f32 %v864_v35 }
 0x51f   : > { %1579 = vmatpush3.bf16.msra.mxu1 %v980_v33 }
 0x520   : > { %v1671_v28 = vpop.eup %1670  ;;  %1590 = vmatprep.subr.bf16.mxu1 %v1692_v8 }
 0x521   : > { %v870_v36 = vmul.f32 %v1671_v28, %v1663_v20  ;;  %v927_v37 = vpop.permute.xlu0 %926  ;;  %v1023_v39 = vpop.permute.xlu1 %1022  ;;  %v1650_v28 = vld [vmem:[%s2013_s12] sm:$0xff]  }
 0x522   : > { %v932_v38 = vsel %vm882_vm3, %v927_v37, 0  ;;  %v1028_v43 = vsel %vm882_vm3, %v1023_v39, 0  ;;  %v1652_v37 = vld [vmem:[%s2013_s12 + $0x10] sm:$0xff]   ;;  %v1654_v39 = vld [vmem:[%s2013_s12 + $0x20] sm:$0xff]  }
 0x523   : > { %1573 = vmatpush3.bf16.msra.mxu0 %v932_v38  ;;  %v874_v40 = vpack.c.bf16 %v870_v36, %v870_v36  ;;  %v1651_v36 = vld [vmem:[%s2013_s12 + $0x8] sm:$0xff]   ;;  %v1653_v38 = vld [vmem:[%s2013_s12 + $0x18] sm:$0xff]  }
 0x524   : > { %v1673_v41 = vpop.eup %1672  ;;  %1584 = vmatprep.subr.bf16.mxu0 %v1692_v8 }
 0x525   : > { %v871_v42 = vmul.f32 %v1673_v41, %v1665_v22  ;;  %v1656_v41 = vld [vmem:[%s2013_s12 + $0x30] sm:$0xff]  }
 0x526   : > { %1575 = vmatmul.mubr.msk.bf16.vlgmr.msra.gmra.mrb[16].mxu0 %vm635_vm2, %v874_v40  ;;  %v1655_v40 = vld [vmem:[%s2013_s12 + $0x28] sm:$0xff]  }
 0x527   : > { %1585 = vmatpush3.bf16.msra.mxu0 %v1028_v43  ;;  %v875_v44 = vpack.c.bf16 %v871_v42, %v871_v42  ;;  %1586 = vmatprep.mubr.msk.bf16.mxu0 %vm1693_vm1, %v1692_v8  ;;  %v1657_v42 = vld [vmem:[%s2013_s12 + $0x38] sm:$0xff]   ;;  %v1482_v43 = vld [vmem:[%s2012_s11] ss:$0 sm:$0xff] }
 0x528   : > { %v1675_v45 = vpop.eup %1674  ;;  %1598 = vmatprep.subr.bf16.mxu0 %v1692_v8 }
 0x529   : > { %v872_v46 = vmul.f32 %v1675_v45, %v1667_v24  ;;  %1581 = vmatmul.mubr.msk.bf16.vlgmr.msra.gmra.mrb[8].mxu1 %vm635_vm2, %v875_v44  ;;  %v1648_v24 = vld [vmem:[%s2011_s10] sm:$0xff]  }
 0x52a   : > { %1594 = vmatprep.mubr.msk.bf16.mxu1 %vm1693_vm1, %v1692_v8  ;;  %1591 = vmatpush3.bf16.msra.mxu1 %v1646_v52 }
 0x52b   : > { %v876_v47 = vpack.c.bf16 %v872_v46, %v872_v46  ;;  %1592 = vmatprep.subr.bf16.mxu1 %v1692_v8 }
 0x52e   : > { %1587 = vmatmul.mubr.msk.bf16.vlgmr.msra.gmra.mrb[20].mxu0 %vm635_vm2, %v876_v47  ;;  %1593 = vmatpush3.bf16.msra.mxu1 %v1647_v53 }
 0x52f   : > { %1602 = vmatprep.mubr.msk.bf16.mxu0 %vm1693_vm1, %v1692_v8  ;;  %1606 = vmatprep.subr.bf16.mxu1 %v1692_v8 }
 0x530   : > { %1599 = vmatpush3.bf16.msra.mxu0 %v1648_v24 }
 0x531   : > { %1600 = vmatprep.subr.bf16.mxu0 %v1692_v8 }
 0x593   : > { %v920_v48 = vpop.f32.mrb[4].mxu1 }
 0x594   : > { %v1570_v49 = vpop.f32.mrb[5].mxu1 }
 0x595   : > { %v923_v50 = vpop.f32.mrb[6].mxu1 }
 0x596   : > { %v1571_v51 = vpop.f32.mrb[7].mxu1 }
 0x5f9   : > { %v968_v54 = vpop.f32.mrb[16].mxu0 }
 0x5fa   : > { %1071 = vrot.lane.b32.xlu0 %v968_v54, %s1699_s25  ;;  %v1576_v55 = vpop.f32.mrb[17].mxu0 }
 0x5fb   : > { %v971_v56 = vpop.f32.mrb[18].mxu0  ;;  %v1487_v55 = vld [vmem:[%s2014_s13] ss:$0 sm:$0xff] }
 0x5fc   : > { %v1577_v57 = vpop.f32.mrb[19].mxu0  ;;  %v1016_v58 = vpop.f32.mrb[8].mxu1 }
 0x5fd   : > { %1075 = vrot.lane.b32.xlu1 %v1016_v58, %s1700_s26  ;;  %v1582_v59 = vpop.f32.mrb[9].mxu1 }
 0x5fe   : > { %v1019_v60 = vpop.f32.mrb[10].mxu1 }
 0x5ff   : > { %v1583_v61 = vpop.f32.mrb[11].mxu1 }
 0x601   : > { %v1064_v62 = vpop.f32.mrb[20].mxu0 }
 0x602   : > { %1079 = vrot.lane.b32.xlu0 %v1064_v62, %s1701_s27  ;;  %v1588_v63 = vpop.f32.mrb[21].mxu0 }
 0x603   : > { %v1067_v1 = vpop.f32.mrb[22].mxu0 }
 0x604   : > { %v1589_v2 = vpop.f32.mrb[23].mxu0 }
 0x66c   : > { %v1072_v3 = vpop.permute.xlu0 %1071 }
 0x66d   : > { %v1082_v5 = vsel %vm635_vm2, %v920_v48, %v1072_v3 }
 0x66f   : > { %v1076_v4 = vpop.permute.xlu1 %1075 }
 0x670   : > { %v1084_v6 = vsel %vm1083_vm4, %v1082_v5, %v1076_v4 }
 0x674   : > { %v1080_v7 = vpop.permute.xlu0 %1079 }
 0x675   : > { %v1086_v9 = vsel %vm1085_vm5, %v1084_v6, %v1080_v7 }
 0x676   : > { %v1087_v10 = vpack.c.bf16 %v1086_v9, %v1086_v9 }
 0x678   : > { %1595 = vmatmul.mubr.msk.bf16.vlgmr.msra.gmra.mrb[12].mxu1 %vm521_vm0, %v1087_v10  ;;  %v1496_v10 = vld [vmem:[%s2015_s14] ss:$0 sm:$0xff] }
 0x679   : > { %1622 = vmatprep.mubr.msk.bf16.mxu1 %vm1693_vm1, %v1692_v8  ;;  %1607 = vmatpush3.bf16.msra.mxu1 %v1650_v28 }
 0x67a   : > { %1608 = vmatprep.subr.bf16.mxu1 %v1692_v8 }
 0x67d   : > { %1609 = vmatpush3.bf16.msra.mxu1 %v1651_v36 }
 0x67e   : > { %1610 = vmatprep.subr.bf16.mxu1 %v1692_v8 }
 0x681   : > { %1611 = vmatpush3.bf16.msra.mxu1 %v1652_v37 }
 0x682   : > { %1612 = vmatprep.subr.bf16.mxu1 %v1692_v8 }
 0x685   : > { %1613 = vmatpush3.bf16.msra.mxu1 %v1653_v38 }
 0x686   : > { %1614 = vmatprep.subr.bf16.mxu1 %v1692_v8 }
 0x689   : > { %1615 = vmatpush3.bf16.msra.mxu1 %v1654_v39 }
 0x68a   : > { %1616 = vmatprep.subr.bf16.mxu1 %v1692_v8 }
 0x68d   : > { %1617 = vmatpush3.bf16.msra.mxu1 %v1655_v40 }
 0x68e   : > { %1618 = vmatprep.subr.bf16.mxu1 %v1692_v8 }
 0x691   : > { %1619 = vmatpush3.bf16.msra.mxu1 %v1656_v41 }
 0x692   : > { %1620 = vmatprep.subr.bf16.mxu1 %v1692_v8 }
 0x695   : > { %1621 = vmatpush3.bf16.msra.mxu1 %v1657_v42 }
 0x74b   : > { %v1148_v12 = vpop.f32.mrb[12].mxu1 }
 0x74c   : > { %v1149_v13 = vadd.f32 %v1476_v11, %v1148_v12  ;;  %v1596_v14 = vpop.f32.mrb[13].mxu1  ;;  %v1497_v12 = vld [vmem:[%s2016_s15] ss:$0 sm:$0xff] }
 0x74d   : > { %v1151_v15 = vpop.f32.mrb[14].mxu1 }
 0x74e   : > { %v1926_v16 = vadd.f32 %v1149_v13, %v1803_v0  ;;  %v1597_v17 = vpop.f32.mrb[15].mxu1  ;;  %v1649_v0 = vld [vmem:[%s2011_s10 + $0x8] sm:$0xff]  }
 0x74f   : > { %1601 = vmatpush3.bf16.msra.mxu0 %v1649_v0 }
 0x750   : > { %v1157_v18 = vsel %vm521_vm0, %v1926_v16, 0.0 }
 0x751   : > { %1158 = vadd.xlane.f32.xlu1 %v1157_v18 }
 0x7de   : > { %v1159_v19 = vpop.xlane.xlu1 %1158 }
 0x7df   : > { %v1160_v20 = vmul.f32 0.03125, %v1159_v19 }
 0x7e1   : > { %v1161_v21 = vsub.f32 %v1926_v16, %v1160_v20 }
 0x7e3   : > { %v1162_v22 = vmul.f32 %v1161_v21, %v1161_v21 }
 0x7e5   : > { %v1163_v23 = vsel %vm521_vm0, %v1162_v22, 0.0 }
 0x7e6   : > { %1164 = vadd.xlane.f32.xlu0 %v1163_v23 }
 0x873   : > { %v1165_v25 = vpop.xlane.xlu0 %1164 }
 0x874   : > { %v1166_v26 = vmul.f32 0.03125, %v1165_v25 }
 0x876   : > { %v1167_v27 = vadd.f32 1e-05, %v1166_v26 }
 0x878   : > { %1676 = vrsqrt.f32 %v1167_v27 }
 0x882   : > { %v1677_v29 = vpop.eup %1676 }
 0x883   : > { %v1169_v32 = vmul.f32 %v1677_v29, %v1161_v21 }
 0x885   : > { %v1176_v30 = vmul.f32 %v1480_v31, %v1169_v32 }
 0x887   : > { %v1183_v35 = vadd.f32 %v1481_v34, %v1176_v30 }
 0x889   : > { %v1184_v33 = vpack.c.bf16 %v1183_v35, %v1183_v35 }
 0x88b   : > { %1603 = vmatmul.mubr.msk.bf16.vlgmr.msra.gmra.mrb[24].mxu0 %vm521_vm0, %v1184_v33 }
 0x95e   : > { %v1245_v44 = vpop.f32.mrb[24].mxu0 }
 0x95f   : > { %v1246_v45 = vadd.f32 %v1482_v43, %v1245_v44  ;;  %v1604_v46 = vpop.f32.mrb[25].mxu0 }
 0x960   : > { %v1248_v47 = vpop.f32.mrb[26].mxu0 }
 0x961   : > { %v1486_v48 = vmul.f32 -1.702, %v1246_v45  ;;  %v1605_v49 = vpop.f32.mrb[27].mxu0 }
 0x963   : > { %v1253_v50 = vmul.f32 1.442695, %v1486_v48 }
 0x965   : > { %1678 = vpow2.f32 %v1253_v50 }
 0x96f   : > { %v1679_v51 = vpop.eup %1678 }
 0x970   : > { %v1255_v52 = vadd.f32 1.0, %v1679_v51 }
 0x972   : > { %1680 = vrcp.f32 %v1255_v52 }
 0x97c   : > { %v1681_v8 = vpop.eup %1680 }
 0x97d   : > { %v1258_v53 = vmul.f32 %v1681_v8, %v1246_v45 }
 0x97f   : > { %v1259_v54 = vpack.c.bf16 %v1258_v53, %v1258_v53 }
 0x981   : > { %1623 = vmatmul.mubr.bf16.vlgmr.msra.gmra.mrb[16].mxu1 %v1259_v54 }
 0xa54   : > { %v1365_v56 = vpop.f32.mrb[16].mxu1 }
 0xa55   : > { %v1366_v57 = vadd.f32 %v1487_v55, %v1365_v56  ;;  %v1624_v58 = vpop.f32.mrb[17].mxu1 }
 0xa56   : > { %v1368_v59 = vpop.f32.mrb[18].mxu1 }
 0xa57   : > { %v1625_v60 = vpop.f32.mrb[19].mxu1  ;;  %v1371_v61 = vadd.f32 %v1366_v57, %v1926_v16 }
 0xa59   : > { %v1374_v62 = vsel %vm521_vm0, %v1371_v61, 0.0 }
 0xa5a   : > { %1375 = vadd.xlane.f32.xlu0 %v1374_v62 }
 0xae7   : > { %v1376_v63 = vpop.xlane.xlu0 %1375 }
 0xae8   : > { %v1377_v1 = vmul.f32 0.03125, %v1376_v63 }
 0xaea   : > { %v1378_v2 = vsub.f32 %v1371_v61, %v1377_v1 }
 0xaec   : > { %v1379_v3 = vmul.f32 %v1378_v2, %v1378_v2 }
 0xaee   : > { %v1380_v4 = vsel %vm521_vm0, %v1379_v3, 0.0 }
 0xaef   : > { %1381 = vadd.xlane.f32.xlu1 %v1380_v4 }
 0xb7c   : > { %v1382_v5 = vpop.xlane.xlu1 %1381 }
 0xb7d   : > { %v1383_v6 = vmul.f32 0.03125, %v1382_v5 }
 0xb7f   : > { %v1384_v7 = vadd.f32 1e-05, %v1383_v6 }
 0xb81   : > { %1682 = vrsqrt.f32 %v1384_v7 }
 0xb8b   : > { %v1683_v9 = vpop.eup %1682 }
 0xb8c   : > { %v1386_v11 = vmul.f32 %v1683_v9, %v1378_v2 }
 0xb8e   : > { %v1393_v13 = vmul.f32 %v1496_v10, %v1386_v11 }
 0xb90   : > { %v1400_v14 = vadd.f32 %v1497_v12, %v1393_v13 }
 0xb92   : > { %1401 = vst.msk [vmem:[%s516_s28] sm:$0xff] %vm521_vm0, %v1400_v14 }
 0xb93 PF: > { %s26_s21 = sadd.s32 1, %s1690_s21  }
 0xb94   : > { %p23_p4 = scmp.ge.s32.totalorder %s26_s21, 4  }
 0xb96   :  { %25 = sbr.rel (!%p23_p4) target bundleno = 2 (0x2), region = 114 }

// kernel: sd_clip_forward.2
= control target key start
LH: loop header
LB: loop body
LE: loop exit
PB: predicated region body
PF: predicated region fallthrough
CT: control target
= control target key end

     0   :  { %s1754_s21 = smov 0   ;;  %s1960_s0 = inlined_call_operand.vmem [shape: f32[2,8,32], index: 0, kind: input, shape index: {}, may-alias: {0,16}]   ;;  %s1961_s1 = inlined_call_operand.vmem [shape: f32[8,8], index: 1, kind: input, shape index: {}]   ;;  %s1962_s2 = inlined_call_operand.vmem [shape: f32[1,32], index: 2, kind: input, shape index: {}]   ;;  %s1963_s3 = inlined_call_operand.vmem [shape: f32[1,32], index: 3, kind: input, shape index: {}]   ;;  %s1964_s4 = inlined_call_operand.vmem [shape: bf16[32,96], index: 4, kind: input, shape index: {}]   ;;  %s1965_s5 = inlined_call_operand.vmem [shape: f32[1,96], index: 5, kind: input, shape index: {}]   ;;  %s1966_s6 = inlined_call_operand.vmem [shape: bf16[32,32], index: 6, kind: input, shape index: {}]   ;;  %s1967_s7 = inlined_call_operand.vmem [shape: f32[1,32], index: 7, kind: input, shape index: {}]   ;;  %s1968_s8 = inlined_call_operand.vmem [shape: f32[1,32], index: 8, kind: input, shape index: {}]   ;;  %s1969_s9 = inlined_call_operand.vmem [shape: f32[1,32], index: 9, kind: input, shape index: {}]   ;;  %s1970_s10 = inlined_call_operand.vmem [shape: bf16[32,128], index: 10, kind: input, shape index: {}]   ;;  %s1971_s11 = inlined_call_operand.vmem [shape: f32[1,128], index: 11, kind: input, shape index: {}]   ;;  %s1972_s12 = inlined_call_operand.vmem [shape: bf16[128,32], index: 12, kind: input, shape index: {}]   ;;  %s1973_s13 = inlined_call_operand.vmem [shape: f32[1,32], index: 13, kind: input, shape index: {}]   ;;  %s1974_s14 = inlined_call_operand.vmem [shape: f32[1,32], index: 14, kind: input, shape index: {}]   ;;  %s1975_s15 = inlined_call_operand.vmem [shape: f32[1,32], index: 15, kind: input, shape index: {}]   ;;  %s1976_s16 = inlined_call_operand.vmem [shape: f32[2,8,32], index: 16, kind: output, shape index: {}, may-alias: {0,16}]  }
   0x1   :  { %1977 = sst [smem:[#allocation2_spill]] %s1960_s0 }
   0x2 LB: > { %s1426_s22 = sadd.s32 4294967295, %s1657_s21   ;;  %p1430_p0 = scmp.ge.s32.totalorder %s1657_s21, 1  ;;  %s1657_s21 = sphi %s1754_s21, %s26_s21  }
   0x3   : > { %p461_p1 = scmp.lt.s32.totalorder %s1657_s21, 3 }
   0x5   : > { %p462_p2 = pnand %p1430_p0, %p461_p1 }
   0x6   : > { %p509_p3 = scmp.lt.s32.totalorder (!%p462_p2), %s1426_s22, 1  ;;  %vm521_vm0 = vcmask (!%p462_p2), 261120   ;;  %s1978_s24 = sld [smem:[#allocation2_spill]] (!%p462_p2)  ;;  %v1613_v7 = vld [vmem:[%s1964_s4] sm:$0xff] (!%p462_p2)   ;;  %v1659_v8 = vmov (!%p462_p2), 0.0   ;;  %vm1660_vm1 = vmmov (!%p462_p2), 0  }
   0x7   : > { %465 = sbr.rel (%p462_p2) target bundleno = 2650 (0xa5a), region = 84  ;;  %1503 = vmatprep.subr.bf16.mxu0 (!%p462_p2), %v1659_v8  ;;  %1507 = vmatprep.mubr.msk.bf16.mxu0 (!%p462_p2), %vm1660_vm1, %v1659_v8  ;;  %v1614_v9 = vld [vmem:[%s1964_s4 + $0x8] sm:$0xff] (!%p462_p2)   ;;  %v1433_v14 = vld [vmem:[%s1962_s2] ss:$0 sm:$0xff] (!%p462_p2)  ;;  %s1661_s15 = smov (!%p462_p2), 104   ;;  %vm635_vm2 = vcmask (!%p462_p2), 64512  }
   0x8   : > { %1504 = vmatpush3.bf16.msra.mxu0 (!%p462_p2), %v1613_v7  ;;  %1523 = vmatprep.subr.bf16.mxu1 (!%p462_p2), %v1659_v8  ;;  %v1434_v16 = vld [vmem:[%s1963_s3] ss:$0 sm:$0xff] (!%p462_p2)  ;;  %s1662_s23 = smov (!%p462_p2), 120   ;;  %s1665_s28 = smov (!%p462_p2), 64   ;;  %vm882_vm3 = vcmask (!%p462_p2), 1043456   ;;  %vm1083_vm4 = vcmask (!%p462_p2), 130048  }
   0x9   : > { %1505 = vmatprep.subr.bf16.mxu0 (!%p462_p2), %v1659_v8  ;;  %1525 = vmatprep.mubr.msk.bf16.mxu1 (!%p462_p2), %vm1660_vm1, %v1659_v8  ;;  %v1435_v20 = vld [vmem:[%s1965_s5] ss:$0 sm:$0xff] (!%p462_p2)  ;;  %s1666_s18 = smov (!%p462_p2), 8   ;;  %s1667_s19 = smov (!%p462_p2), 16   ;;  %vm1085_vm5 = vcmask (!%p462_p2), 195584  }
   0xa   : > { %v631_v41 = vld [vmem:[%s1961_s1] sm:$0xff] (!%p462_p2)  ;;  %s1668_s20 = smov (!%p462_p2), 24  }
   0xc   : > { %1506 = vmatpush3.bf16.msra.mxu0 (!%p462_p2), %v1614_v9 }
   0xd   : > { %1511 = vmatprep.subr.bf16.mxu0 (!%p462_p2), %v1659_v8 }
   0xe   : > { %s1980_s22 = smov (!%p509_p3, %s1426_s22), 1 }
   0xf   : > { %s1431_s14 = sshll.u32 %s1980_s22, 3 }
  0x10   : > { %s512_s25 = scalar_lea.vmem %s1978_s24, %s1431_s14  ;;  %s1663_s24 = smov 112  }
  0x11   : > { %v1770_v0 = vld [vmem:[%s512_s25] sm:$0xff]  ;;  %s1664_s25 = smov 96   ;;  %s516_s26 = scalar_lea.vmem %s1976_s16, %s1431_s14 }
  0x12   : > { %v522_v1 = vsel %vm521_vm0, %v1770_v0, 0.0 }
  0x13   : > { %523 = vadd.xlane.f32.xlu0 %v522_v1 }
  0xa0   : > { %v524_v2 = vpop.xlane.xlu0 %523 }
  0xa1   : > { %v526_v3 = vmul.f32 0.03125, %v524_v2 }
  0xa3   : > { %v527_v4 = vsub.f32 %v1770_v0, %v526_v3 }
  0xa5   : > { %v528_v5 = vmul.f32 %v527_v4, %v527_v4 }
  0xa7   : > { %v529_v6 = vsel %vm521_vm0, %v528_v5, 0.0 }
  0xa8   : > { %530 = vadd.xlane.f32.xlu0 %v529_v6 }
 0x135   : > { %v531_v10 = vpop.xlane.xlu0 %530 }
 0x136   : > { %v532_v11 = vmul.f32 0.03125, %v531_v10 }
 0x138   : > { %v533_v12 = vadd.f32 1e-05, %v532_v11 }
 0x13a   : > { %1627 = vrsqrt.f32 %v533_v12 }
 0x144   : > { %v1628_v13 = vpop.eup %1627 }
 0x145   : > { %v535_v15 = vmul.f32 %v1628_v13, %v527_v4 }
 0x147   : > { %v542_v17 = vmul.f32 %v1433_v14, %v535_v15 }
 0x149   : > { %v549_v18 = vadd.f32 %v1434_v16, %v542_v17 }
 0x14b   : > { %v550_v19 = vpack.c.bf16 %v549_v18, %v549_v18 }
 0x14d   : > { %1508 = vmatmul.mubr.msk.bf16.vlgmr.msra.gmra.mrb[0].mxu0 %vm521_vm0, %v550_v19 }
 0x14e   : > { %1513 = vmatprep.mubr.msk.bf16.mxu0 %vm1660_vm1, %v1659_v8 }
 0x220   : > { %v611_v21 = vpop.f32.mrb[0].mxu0 }
 0x221   : > { %v612_v22 = vadd.f32 %v1435_v20, %v611_v21  ;;  %v1509_v23 = vpop.f32.mrb[1].mxu0 }
 0x222   : > { %v614_v24 = vpop.f32.mrb[2].mxu0 }
 0x223   : > { %624 = vrot.lane.b32.xlu0 %v612_v22, %s1661_s15  ;;  %618 = vrot.lane.b32.xlu1 %v612_v22, %s1662_s23  ;;  %v1510_v25 = vpop.f32.mrb[3].mxu0  ;;  %v1802_v26 = vpack.c.bf16 %v612_v22, %v612_v22 }
 0x227   : > { %621 = vrot.lane.b32.xlu1 %v612_v22, %s1663_s24 }
 0x22b   : > { %633 = vrot.lane.b32.xlu1 %v1802_v26, %s1664_s25 }
 0x295   : > { %v619_v27 = vpop.permute.xlu1 %618  ;;  %v625_v31 = vpop.permute.xlu0 %624 }
 0x296   : > { %v1805_v28 = vpack.c.bf16 %v619_v27, %v619_v27  ;;  %v1811_v33 = vpack.c.bf16 %v625_v31, %v625_v31 }
 0x298   : > { %683 = vrot.lane.b32.xlu1 %v1805_v28, %s1664_s25 }
 0x299   : > { %v622_v29 = vpop.permute.xlu1 %621 }
 0x29a   : > { %v1808_v30 = vpack.c.bf16 %v622_v29, %v622_v29 }
 0x29c   : > { %732 = vrot.lane.b32.xlu1 %v1808_v30, %s1664_s25 }
 0x29d   : > { %v634_v32 = vpop.permute.xlu1 %633 }
 0x29e   : > { %v640_v34 = vsel %vm635_vm2, %v634_v32, 0 }
 0x29f   : > { %1512 = vmatpush3.bf16.xpose.msra.mxu0 %v640_v34 }
 0x2a0   : > { %781 = vrot.lane.b32.xlu1 %v1811_v33, %s1664_s25  ;;  %1517 = vmatprep.subr.bf16.mxu0 %v1659_v8 }
 0x2a6   : > { %1514 = vmatmul.mubr.msk.bf16.vlgmr.msra.gmra.mrb[4].mxu0 %vm635_vm2, %v1802_v26 }
 0x2a7   : > { %1519 = vmatprep.mubr.msk.bf16.mxu0 %vm1660_vm1, %v1659_v8 }
 0x30a   : > { %v684_v35 = vpop.permute.xlu1 %683 }
 0x30b   : > { %v689_v36 = vsel %vm635_vm2, %v684_v35, 0 }
 0x30c   : > { %1518 = vmatpush3.bf16.xpose.msra.mxu0 %v689_v36 }
 0x30d   : > { %1529 = vmatprep.subr.bf16.mxu0 %v1659_v8 }
 0x30e   : > { %v733_v37 = vpop.permute.xlu1 %732 }
 0x30f   : > { %v738_v38 = vsel %vm635_vm2, %v733_v37, 0 }
 0x310   : > { %1524 = vmatpush3.bf16.xpose.msra.mxu1 %v738_v38 }
 0x311   : > { %1535 = vmatprep.subr.bf16.mxu1 %v1659_v8 }
 0x312   : > { %v782_v39 = vpop.permute.xlu1 %781 }
 0x313   : > { %v787_v40 = vsel %vm635_vm2, %v782_v39, 0  ;;  %1520 = vmatmul.mubr.msk.bf16.vlgmr.msra.gmra.mrb[8].mxu0 %vm635_vm2, %v1805_v28 }
 0x314   : > { %1530 = vmatpush3.bf16.xpose.msra.mxu0 %v787_v40  ;;  %1531 = vmatprep.mubr.msk.bf16.mxu0 %vm1660_vm1, %v1659_v8 }
 0x315   : > { %1541 = vmatprep.subr.bf16.mxu0 %v1659_v8 }
 0x317   : > { %1526 = vmatmul.mubr.msk.bf16.vlgmr.msra.gmra.mrb[0].mxu1 %vm635_vm2, %v1808_v30 }
 0x318   : > { %1537 = vmatprep.mubr.msk.bf16.mxu1 %vm1660_vm1, %v1659_v8 }
 0x31b   : > { %1532 = vmatmul.mubr.msk.bf16.vlgmr.msra.gmra.mrb[12].mxu0 %vm635_vm2, %v1811_v33 }
 0x31c   : > { %1543 = vmatprep.mubr.msk.bf16.mxu0 %vm1660_vm1, %v1659_v8 }
 0x379   : > { %v676_v42 = vpop.f32.mrb[4].mxu0 }
 0x37a   : > { %v677_v43 = vadd.f32 %v676_v42, %v631_v41  ;;  %v1515_v44 = vpop.f32.mrb[5].mxu0 }
 0x37b   : > { %v679_v45 = vpop.f32.mrb[6].mxu0 }
 0x37c   : > { %v1516_v46 = vpop.f32.mrb[7].mxu0  ;;  %v829_v47 = vsel %vm635_vm2, %v677_v43, -inf }
 0x37d   : > { %830 = vmax.xlane.f32.xlu1 %v829_v47 }
 0x3e6   : > { %v725_v48 = vpop.f32.mrb[8].mxu0 }
 0x3e7   : > { %v726_v49 = vadd.f32 %v725_v48, %v631_v41  ;;  %v1521_v50 = vpop.f32.mrb[9].mxu0 }
 0x3e8   : > { %v728_v51 = vpop.f32.mrb[10].mxu0 }
 0x3e9   : > { %v1522_v52 = vpop.f32.mrb[11].mxu0  ;;  %v832_v53 = vsel %vm635_vm2, %v726_v49, -inf }
 0x3ea   : > { %v774_v54 = vpop.f32.mrb[0].mxu1  ;;  %833 = vmax.xlane.f32.xlu0 %v832_v53  ;;  %v1615_v52 = vld [vmem:[%s1966_s6] sm:$0xff]   ;;  %v1616_v53 = vld [vmem:[%s1966_s6 + $0x8] sm:$0xff]  }
 0x3eb   : > { %v775_v55 = vadd.f32 %v774_v54, %v631_v41  ;;  %v1527_v56 = vpop.f32.mrb[1].mxu1 }
 0x3ec   : > { %v777_v57 = vpop.f32.mrb[2].mxu1 }
 0x3ed   : > { %v1528_v58 = vpop.f32.mrb[3].mxu1  ;;  %v835_v59 = vsel %vm635_vm2, %v775_v55, -inf }
 0x3ee   : > { %836 = vmax.xlane.f32.xlu1 %v835_v59  ;;  %v823_v60 = vpop.f32.mrb[12].mxu0 }
 0x3ef   : > { %v824_v61 = vadd.f32 %v823_v60, %v631_v41  ;;  %v1533_v62 = vpop.f32.mrb[13].mxu0 }
 0x3f0   : > { %v826_v63 = vpop.f32.mrb[14].mxu0 }
 0x3f1   : > { %v1534_v1 = vpop.f32.mrb[15].mxu0  ;;  %v838_v2 = vsel %vm635_vm2, %v824_v61, -inf }
 0x3f2   : > { %839 = vmax.xlane.f32.xlu0 %v838_v2 }
 0x3ff   : > { %877 = vrot.lane.b32.xlu1 %v1802_v26, %s1665_s28 }
 0x40a   : > { %v831_v3 = vpop.xlane.xlu1 %830 }
 0x40b   : > { %v841_v4 = vsub.f32 %v677_v43, %v831_v3 }
 0x40d   : > { %v845_v5 = vmul.f32 1.442695, %v841_v4 }
 0x40f   : > { %1629 = vpow2.f32 %v845_v5 }
 0x419   : > { %v1630_v6 = vpop.eup %1629 }
 0x41a   : > { %v853_v7 = vsel %vm635_vm2, %v1630_v6, 0.0 }
 0x423   : > { %854 = vadd.xlane.f32.xlu1 %v853_v7 }
 0x477   : > { %v834_v9 = vpop.xlane.xlu0 %833 }
 0x478   : > { %v842_v10 = vsub.f32 %v726_v49, %v834_v9 }
 0x47a   : > { %v847_v11 = vmul.f32 1.442695, %v842_v10 }
 0x47b   : > { %v837_v12 = vpop.xlane.xlu1 %836 }
 0x47c   : > { %1631 = vpow2.f32 %v847_v11  ;;  %v843_v13 = vsub.f32 %v775_v55, %v837_v12  ;;  %v1447_v11 = vld [vmem:[%s1967_s7] ss:$0 sm:$0xff] }
 0x47e   : > { %v849_v14 = vmul.f32 1.442695, %v843_v13 }
 0x47f   : > { %v878_v15 = vpop.permute.xlu1 %877  ;;  %v840_v16 = vpop.xlane.xlu0 %839 }
 0x480   : > { %1633 = vpow2.f32 %v849_v14  ;;  %v884_v17 = vsel %vm882_vm3, %v878_v15, 0  ;;  %v844_v18 = vsub.f32 %v824_v61, %v840_v16 }
 0x481   : > { %1536 = vmatpush3.bf16.msra.mxu1 %v884_v17 }
 0x482   : > { %v851_v19 = vmul.f32 1.442695, %v844_v18  ;;  %1547 = vmatprep.subr.bf16.mxu1 %v1659_v8 }
 0x484   : > { %1635 = vpow2.f32 %v851_v19 }
 0x486   : > { %v1632_v20 = vpop.eup %1631 }
 0x487   : > { %v856_v21 = vsel %vm635_vm2, %v1632_v20, 0.0 }
 0x488   : > { %857 = vadd.xlane.f32.xlu0 %v856_v21 }
 0x48a   : > { %v1634_v22 = vpop.eup %1633 }
 0x48b   : > { %v859_v23 = vsel %vm635_vm2, %v1634_v22, 0.0 }
 0x48c   : > { %860 = vadd.xlane.f32.xlu1 %v859_v23 }
 0x48e   : > { %v1636_v24 = vpop.eup %1635 }
 0x48f   : > { %v862_v25 = vsel %vm635_vm2, %v1636_v24, 0.0 }
 0x490   : > { %863 = vadd.xlane.f32.xlu0 %v862_v25 }
 0x49d   : > { %974 = vrot.lane.b32.xlu1 %v1808_v30, %s1665_s28 }
 0x4a1   : > { %1022 = vrot.lane.b32.xlu1 %v1811_v33, %s1665_s28 }
 0x4a6   : > { %926 = vrot.lane.b32.xlu0 %v1805_v28, %s1665_s28 }
 0x4b0   : > { %v855_v26 = vpop.xlane.xlu1 %854 }
 0x4b1   : > { %1637 = vrcp.f32 %v855_v26 }
 0x4bb   : > { %v1638_v27 = vpop.eup %1637 }
 0x4bc   : > { %v869_v29 = vmul.f32 %v1638_v27, %v1630_v6 }
 0x4be   : > { %v873_v31 = vpack.c.bf16 %v869_v29, %v869_v29 }
 0x4c0   : > { %1538 = vmatmul.mubr.msk.bf16.vlgmr.msra.gmra.mrb[4].mxu1 %vm635_vm2, %v873_v31  ;;  %v1451_v31 = vld [vmem:[%s1968_s8] ss:$0 sm:$0xff] }
 0x4c1   : > { %1549 = vmatprep.mubr.msk.bf16.mxu1 %vm1660_vm1, %v1659_v8 }
 0x515   : > { %v858_v32 = vpop.xlane.xlu0 %857 }
 0x516   : > { %1639 = vrcp.f32 %v858_v32 }
 0x519   : > { %v861_v34 = vpop.xlane.xlu1 %860 }
 0x51a   : > { %1641 = vrcp.f32 %v861_v34  ;;  %v1452_v34 = vld [vmem:[%s1969_s9] ss:$0 sm:$0xff] }
 0x51d   : > { %v975_v30 = vpop.permute.xlu1 %974  ;;  %v864_v35 = vpop.xlane.xlu0 %863 }
 0x51e   : > { %v980_v33 = vsel %vm882_vm3, %v975_v30, 0  ;;  %1643 = vrcp.f32 %v864_v35 }
 0x51f   : > { %1548 = vmatpush3.bf16.msra.mxu1 %v980_v33 }
 0x520   : > { %v1640_v28 = vpop.eup %1639  ;;  %1559 = vmatprep.subr.bf16.mxu1 %v1659_v8 }
 0x521   : > { %v870_v36 = vmul.f32 %v1640_v28, %v1632_v20  ;;  %v927_v37 = vpop.permute.xlu0 %926  ;;  %v1023_v39 = vpop.permute.xlu1 %1022  ;;  %v1619_v28 = vld [vmem:[%s1972_s12] sm:$0xff]  }
 0x522   : > { %v932_v38 = vsel %vm882_vm3, %v927_v37, 0  ;;  %v1028_v43 = vsel %vm882_vm3, %v1023_v39, 0  ;;  %v1621_v37 = vld [vmem:[%s1972_s12 + $0x10] sm:$0xff]   ;;  %v1623_v39 = vld [vmem:[%s1972_s12 + $0x20] sm:$0xff]  }
 0x523   : > { %1542 = vmatpush3.bf16.msra.mxu0 %v932_v38  ;;  %v874_v40 = vpack.c.bf16 %v870_v36, %v870_v36  ;;  %v1620_v36 = vld [vmem:[%s1972_s12 + $0x8] sm:$0xff]   ;;  %v1622_v38 = vld [vmem:[%s1972_s12 + $0x18] sm:$0xff]  }
 0x524   : > { %v1642_v41 = vpop.eup %1641  ;;  %1553 = vmatprep.subr.bf16.mxu0 %v1659_v8 }
 0x525   : > { %v871_v42 = vmul.f32 %v1642_v41, %v1634_v22  ;;  %v1625_v41 = vld [vmem:[%s1972_s12 + $0x30] sm:$0xff]  }
 0x526   : > { %1544 = vmatmul.mubr.msk.bf16.vlgmr.msra.gmra.mrb[16].mxu0 %vm635_vm2, %v874_v40  ;;  %v1624_v40 = vld [vmem:[%s1972_s12 + $0x28] sm:$0xff]  }
 0x527   : > { %1554 = vmatpush3.bf16.msra.mxu0 %v1028_v43  ;;  %v875_v44 = vpack.c.bf16 %v871_v42, %v871_v42  ;;  %1555 = vmatprep.mubr.msk.bf16.mxu0 %vm1660_vm1, %v1659_v8  ;;  %v1626_v42 = vld [vmem:[%s1972_s12 + $0x38] sm:$0xff]   ;;  %v1453_v43 = vld [vmem:[%s1971_s11] ss:$0 sm:$0xff] }
 0x528   : > { %v1644_v45 = vpop.eup %1643  ;;  %1567 = vmatprep.subr.bf16.mxu0 %v1659_v8 }
 0x529   : > { %v872_v46 = vmul.f32 %v1644_v45, %v1636_v24  ;;  %1550 = vmatmul.mubr.msk.bf16.vlgmr.msra.gmra.mrb[8].mxu1 %vm635_vm2, %v875_v44  ;;  %v1617_v24 = vld [vmem:[%s1970_s10] sm:$0xff]  }
 0x52a   : > { %1563 = vmatprep.mubr.msk.bf16.mxu1 %vm1660_vm1, %v1659_v8  ;;  %1560 = vmatpush3.bf16.msra.mxu1 %v1615_v52 }
 0x52b   : > { %v876_v47 = vpack.c.bf16 %v872_v46, %v872_v46  ;;  %1561 = vmatprep.subr.bf16.mxu1 %v1659_v8 }
 0x52e   : > { %1556 = vmatmul.mubr.msk.bf16.vlgmr.msra.gmra.mrb[20].mxu0 %vm635_vm2, %v876_v47  ;;  %1562 = vmatpush3.bf16.msra.mxu1 %v1616_v53 }
 0x52f   : > { %1571 = vmatprep.mubr.msk.bf16.mxu0 %vm1660_vm1, %v1659_v8  ;;  %1575 = vmatprep.subr.bf16.mxu1 %v1659_v8 }
 0x530   : > { %1568 = vmatpush3.bf16.msra.mxu0 %v1617_v24 }
 0x531   : > { %1569 = vmatprep.subr.bf16.mxu0 %v1659_v8 }
 0x593   : > { %v920_v48 = vpop.f32.mrb[4].mxu1 }
 0x594   : > { %v1539_v49 = vpop.f32.mrb[5].mxu1 }
 0x595   : > { %v923_v50 = vpop.f32.mrb[6].mxu1 }
 0x596   : > { %v1540_v51 = vpop.f32.mrb[7].mxu1 }
 0x5f9   : > { %v968_v54 = vpop.f32.mrb[16].mxu0 }
 0x5fa   : > { %1071 = vrot.lane.b32.xlu0 %v968_v54, %s1666_s18  ;;  %v1545_v55 = vpop.f32.mrb[17].mxu0 }
 0x5fb   : > { %v971_v56 = vpop.f32.mrb[18].mxu0  ;;  %v1458_v55 = vld [vmem:[%s1973_s13] ss:$0 sm:$0xff] }
 0x5fc   : > { %v1546_v57 = vpop.f32.mrb[19].mxu0  ;;  %v1016_v58 = vpop.f32.mrb[8].mxu1 }
 0x5fd   : > { %1075 = vrot.lane.b32.xlu1 %v1016_v58, %s1667_s19  ;;  %v1551_v59 = vpop.f32.mrb[9].mxu1 }
 0x5fe   : > { %v1019_v60 = vpop.f32.mrb[10].mxu1 }
 0x5ff   : > { %v1552_v61 = vpop.f32.mrb[11].mxu1 }
 0x601   : > { %v1064_v62 = vpop.f32.mrb[20].mxu0 }
 0x602   : > { %1079 = vrot.lane.b32.xlu0 %v1064_v62, %s1668_s20  ;;  %v1557_v63 = vpop.f32.mrb[21].mxu0 }
 0x603   : > { %v1067_v1 = vpop.f32.mrb[22].mxu0 }
 0x604   : > { %v1558_v2 = vpop.f32.mrb[23].mxu0 }
 0x66c   : > { %v1072_v3 = vpop.permute.xlu0 %1071 }
 0x66d   : > { %v1082_v5 = vsel %vm635_vm2, %v920_v48, %v1072_v3 }
 0x66f   : > { %v1076_v4 = vpop.permute.xlu1 %1075 }
 0x670   : > { %v1084_v6 = vsel %vm1083_vm4, %v1082_v5, %v1076_v4 }
 0x674   : > { %v1080_v7 = vpop.permute.xlu0 %1079 }
 0x675   : > { %v1086_v9 = vsel %vm1085_vm5, %v1084_v6, %v1080_v7 }
 0x676   : > { %v1087_v10 = vpack.c.bf16 %v1086_v9, %v1086_v9 }
 0x678   : > { %1564 = vmatmul.mubr.msk.bf16.vlgmr.msra.gmra.mrb[12].mxu1 %vm521_vm0, %v1087_v10 }
 0x679   : > { %1591 = vmatprep.mubr.msk.bf16.mxu1 %vm1660_vm1, %v1659_v8  ;;  %1576 = vmatpush3.bf16.msra.mxu1 %v1619_v28 }
 0x67a   : > { %1577 = vmatprep.subr.bf16.mxu1 %v1659_v8 }
 0x67d   : > { %1578 = vmatpush3.bf16.msra.mxu1 %v1620_v36 }
 0x67e   : > { %1579 = vmatprep.subr.bf16.mxu1 %v1659_v8 }
 0x681   : > { %1580 = vmatpush3.bf16.msra.mxu1 %v1621_v37 }
 0x682   : > { %1581 = vmatprep.subr.bf16.mxu1 %v1659_v8 }
 0x685   : > { %1582 = vmatpush3.bf16.msra.mxu1 %v1622_v38 }
 0x686   : > { %1583 = vmatprep.subr.bf16.mxu1 %v1659_v8 }
 0x689   : > { %1584 = vmatpush3.bf16.msra.mxu1 %v1623_v39 }
 0x68a   : > { %1585 = vmatprep.subr.bf16.mxu1 %v1659_v8 }
 0x68d   : > { %1586 = vmatpush3.bf16.msra.mxu1 %v1624_v40 }
 0x68e   : > { %1587 = vmatprep.subr.bf16.mxu1 %v1659_v8 }
 0x691   : > { %1588 = vmatpush3.bf16.msra.mxu1 %v1625_v41 }
 0x692   : > { %1589 = vmatprep.subr.bf16.mxu1 %v1659_v8 }
 0x695   : > { %1590 = vmatpush3.bf16.msra.mxu1 %v1626_v42 }
 0x74b   : > { %v1148_v12 = vpop.f32.mrb[12].mxu1 }
 0x74c   : > { %v1149_v13 = vadd.f32 %v1447_v11, %v1148_v12  ;;  %v1565_v14 = vpop.f32.mrb[13].mxu1 }
 0x74d   : > { %v1151_v15 = vpop.f32.mrb[14].mxu1 }
 0x74e   : > { %v1893_v16 = vadd.f32 %v1149_v13, %v1770_v0  ;;  %v1566_v17 = vpop.f32.mrb[15].mxu1  ;;  %v1618_v0 = vld [vmem:[%s1970_s10 + $0x8] sm:$0xff]  }
 0x74f   : > { %1570 = vmatpush3.bf16.msra.mxu0 %v1618_v0 }
 0x750   : > { %v1157_v18 = vsel %vm521_vm0, %v1893_v16, 0.0 }
 0x751   : > { %1158 = vadd.xlane.f32.xlu1 %v1157_v18 }
 0x7de   : > { %v1159_v19 = vpop.xlane.xlu1 %1158 }
 0x7df   : > { %v1160_v20 = vmul.f32 0.03125, %v1159_v19 }
 0x7e1   : > { %v1161_v21 = vsub.f32 %v1893_v16, %v1160_v20 }
 0x7e3   : > { %v1162_v22 = vmul.f32 %v1161_v21, %v1161_v21 }
 0x7e5   : > { %v1163_v23 = vsel %vm521_vm0, %v1162_v22, 0.0 }
 0x7e6   : > { %1164 = vadd.xlane.f32.xlu0 %v1163_v23 }
 0x873   : > { %v1165_v25 = vpop.xlane.xlu0 %1164 }
 0x874   : > { %v1166_v26 = vmul.f32 0.03125, %v1165_v25 }
 0x876   : > { %v1167_v27 = vadd.f32 1e-05, %v1166_v26 }
 0x878   : > { %1645 = vrsqrt.f32 %v1167_v27 }
 0x882   : > { %v1646_v29 = vpop.eup %1645 }
 0x883   : > { %v1169_v32 = vmul.f32 %v1646_v29, %v1161_v21 }
 0x885   : > { %v1176_v30 = vmul.f32 %v1451_v31, %v1169_v32 }
 0x887   : > { %v1183_v35 = vadd.f32 %v1452_v34, %v1176_v30 }
 0x889   : > { %v1184_v33 = vpack.c.bf16 %v1183_v35, %v1183_v35 }
 0x88b   : > { %1572 = vmatmul.mubr.msk.bf16.vlgmr.msra.gmra.mrb[24].mxu0 %vm521_vm0, %v1184_v33 }
 0x95e   : > { %v1245_v44 = vpop.f32.mrb[24].mxu0 }
 0x95f   : > { %v1246_v45 = vadd.f32 %v1453_v43, %v1245_v44  ;;  %v1573_v46 = vpop.f32.mrb[25].mxu0 }
 0x960   : > { %v1248_v47 = vpop.f32.mrb[26].mxu0 }
 0x961   : > { %v1457_v48 = vmul.f32 -1.702, %v1246_v45  ;;  %v1574_v49 = vpop.f32.mrb[27].mxu0 }
 0x963   : > { %v1253_v50 = vmul.f32 1.442695, %v1457_v48 }
 0x965   : > { %1647 = vpow2.f32 %v1253_v50 }
 0x96f   : > { %v1648_v51 = vpop.eup %1647 }
 0x970   : > { %v1255_v8 = vadd.f32 1.0, %v1648_v51 }
 0x972   : > { %1649 = vrcp.f32 %v1255_v8 }
 0x97c   : > { %v1650_v52 = vpop.eup %1649 }
 0x97d   : > { %v1258_v53 = vmul.f32 %v1650_v52, %v1246_v45 }
 0x97f   : > { %v1259_v54 = vpack.c.bf16 %v1258_v53, %v1258_v53 }
 0x981   : > { %1592 = vmatmul.mubr.bf16.vlgmr.msra.gmra.mrb[16].mxu1 %v1259_v54 }
 0xa54   : > { %v1365_v56 = vpop.f32.mrb[16].mxu1 }
 0xa55   : > { %v1366_v57 = vadd.f32 %v1458_v55, %v1365_v56  ;;  %v1593_v58 = vpop.f32.mrb[17].mxu1 }
 0xa56   : > { %v1368_v59 = vpop.f32.mrb[18].mxu1 }
 0xa57   : > { %v1371_v60 = vadd.f32 %v1366_v57, %v1893_v16  ;;  %v1594_v61 = vpop.f32.mrb[19].mxu1 }
 0xa59   : > { %1372 = vst.msk [vmem:[%s516_s26] sm:$0xff] %vm521_vm0, %v1371_v60 }
 0xa5a PF: > { %s26_s21 = sadd.s32 1, %s1657_s21  }
 0xa5b   : > { %p23_p4 = scmp.ge.s32.totalorder %s26_s21, 4  }
 0xa5d   :  { %25 = sbr.rel (!%p23_p4) target bundleno = 2 (0x2), region = 114 }

</bundles_post_ra>
